<compile_context>
chip_gen: v5e
topology: v5e:2x2
jax: 0.10.0
libtpu: 0.0.40
codegen_flags: <defaults>
</compile_context>

<pallas_src>
import functools
import math

import jax
import jax.numpy as jnp
from jax import lax
from jax.experimental import pallas as pl
from jax.experimental.pallas import tpu as pltpu

LANES = 128
SUBLANES = 8
MAX_BLOCK_B = 256


def _round_up(x, m):
    return ((x + m - 1) // m) * m


# ----------------------------- Pallas kernel ------------------------------ #

def fused_dqn_kernel(x_ref, cam_ref,
                     w1_ref, b1_ref, w2_ref, b2_ref, w3_ref, b3_ref,
                     we_ref, be_ref, wp_ref, bp_ref,
                     w1e_ref, w1c_ref, bc1_ref, wo_ref, bo_ref,
                     o_ref):
    """Entire DQN forward for one batch tile, fully VMEM-resident."""
    f32 = jnp.float32

    def mm(a, w_ref):
        return jnp.dot(a, w_ref[...], preferred_element_type=f32)

    # Encoder: three stride-2 Conv3d + ReLU, expressed as dense conv matrices.
    h = jnp.maximum(mm(x_ref[...], w1_ref) + b1_ref[...], 0.0)        # (Bt, 512)
    h = jnp.maximum(mm(h, w2_ref) + b2_ref[...], 0.0)                 # (Bt, 128)
    h = jnp.maximum(mm(h, w3_ref) + b3_ref[...], 0.0)                 # (Bt, 32)

    # Head.
    env_h = jnp.maximum(mm(h, we_ref) + be_ref[...], 0.0)             # (Bt, 64)
    cam_h = jnp.maximum(mm(cam_ref[...], wp_ref) + bp_ref[...], 0.0)  # (Bt, 64)
    # concat([env_h, cam_h]) @ W1  ==  env_h @ W1[:64] + cam_h @ W1[64:]
    hid = jnp.maximum(mm(env_h, w1e_ref) + mm(cam_h, w1c_ref)
                      + bc1_ref[...], 0.0)                            # (Bt, 64)
    # Output layer padded to 128 lanes -> unmasked, lane-dense store.
    o_ref[...] = mm(hid, wo_ref) + bo_ref[...]                        # (Bt, 128)


# ------------------------------ JAX wrapper -------------------------------- #

def dqn_forward(fused, obstacle_state, camera_state, *, n_actions):
    B = obstacle_state.shape[0]
    x = obstacle_state.reshape(B, -1).astype(jnp.float32)             # (B, 512)

    block_b = min(MAX_BLOCK_B, _round_up(B, SUBLANES))
    B_pad = _round_up(B, block_b)
    x = jnp.pad(x, ((0, B_pad - B), (0, 0)))
    cam_k = fused["pos_w"].shape[0]                                   # 8
    cam = jnp.pad(camera_state.astype(jnp.float32),
                  ((0, B_pad - B), (0, cam_k - camera_state.shape[1])))

    row_map = lambda i: (i, 0)
    rep_map = lambda i: (0, 0)

    def full2(a):
        return pl.BlockSpec(a.shape, rep_map)

    in_specs = [
        pl.BlockSpec((block_b, x.shape[1]), row_map),
        pl.BlockSpec((block_b, cam.shape[1]), row_map),
        full2(fused["w1"]), full2(fused["b1"]),
        full2(fused["w2"]), full2(fused["b2"]),
        full2(fused["w3"]), full2(fused["b3"]),
        full2(fused["env_w"]), full2(fused["env_b"]),
        full2(fused["pos_w"]), full2(fused["pos_b"]),
        full2(fused["c1_w_env"]), full2(fused["c1_w_cam"]), full2(fused["c1_b"]),
        full2(fused["out_w"]), full2(fused["out_b"]),
    ]

    out_pad = pl.pallas_call(
        fused_dqn_kernel,
        out_shape=jax.ShapeDtypeStruct((B_pad, LANES), jnp.float32),
        grid=(B_pad // block_b,),
        in_specs=in_specs,
        out_specs=pl.BlockSpec((block_b, LANES), row_map),
        compiler_params=pltpu.CompilerParams(
            dimension_semantics=("parallel",)),
    )(x, cam,
      fused["w1"], fused["b1"], fused["w2"], fused["b2"],
      fused["w3"], fused["b3"],
      fused["env_w"], fused["env_b"], fused["pos_w"], fused["pos_b"],
      fused["c1_w_env"], fused["c1_w_cam"], fused["c1_b"],
      fused["out_w"], fused["out_b"])

    return out_pad[:B, :n_actions]


# -------------------- one-time parameter preparation ----------------------- #

def _conv_as_matrix(w_dhwio, in_spatial):
    """Dense matrix M with flatten(conv(x)) == flatten(x) @ M (bias excluded).

    Flatten order is (D, H, W, C) for both the input and the output, matching
    the NDHWC reshape used in dqn_forward. Built once by running the conv on
    an identity batch (conv is linear), so it is numerically exact.
    """
    cin = w_dhwio.shape[3]
    n_in = in_spatial ** 3 * cin
    eye = jnp.eye(n_in, dtype=jnp.float32).reshape(
        n_in, in_spatial, in_spatial, in_spatial, cin)
    out = lax.conv_general_dilated(
        eye, w_dhwio, window_strides=(2, 2, 2), padding=[(1, 1)] * 3,
        dimension_numbers=("NDHWC", "DHWIO", "NDHWC"))
    return out.reshape(n_in, -1)


def prepare_fused_params(params, n_actions):
    fused = {}
    # Encoder as lowered-conv matrices; biases tiled over output positions
    # (channel axis is fastest in the DHWC flatten).
    fused["w1"] = _conv_as_matrix(params["conv1_w"], 8)            # (512, 512)
    fused["b1"] = jnp.tile(params["conv1_b"], 4 * 4 * 4)[None]     # (1, 512)
    fused["w2"] = _conv_as_matrix(params["conv2_w"], 4)            # (512, 128)
    fused["b2"] = jnp.tile(params["conv2_b"], 2 * 2 * 2)[None]     # (1, 128)
    fused["w3"] = _conv_as_matrix(params["conv3_w"], 2)            # (128, 32)
    fused["b3"] = params["conv3_b"][None]                          # (1, 32)
    # Head.
    fused["env_w"] = params["env_w"]                               # (32, 64)
    fused["env_b"] = params["env_b"]                               # (1, 64)
    # Pad camera contraction dim 4 -> 8 (zero rows; exact).
    fused["pos_w"] = jnp.pad(params["pos_w"], ((0, 4), (0, 0)))    # (8, 64)
    fused["pos_b"] = params["pos_b"]                               # (1, 64)
    fused["c1_w_env"] = params["c1_w_env"]                         # (64, 64)
    fused["c1_w_cam"] = params["c1_w_cam"]                         # (64, 64)
    fused["c1_b"] = params["c1_b"]                                 # (1, 64)
    # Pad the output layer to 128 lanes so the kernel's only store is dense.
    fused["out_w"] = jnp.pad(params["c2_w"],
                             ((0, 0), (0, LANES - n_actions)))     # (64, 128)
    fused["out_b"] = jnp.pad(params["c2_b"],
                             ((0, 0), (0, LANES - n_actions)))     # (1, 128)
    return fused


# ------------------------- parameter initialization ------------------------ #

def init_params(key, n_actions):
    def uniform(key, shape, fan_in):
        bound = 1.0 / math.sqrt(fan_in)
        return jax.random.uniform(key, shape, jnp.float32, -bound, bound)

    ks = jax.random.split(key, 14)
    p = {}
    # Conv weights stored DHWIO.
    p["conv1_w"] = uniform(ks[0], (3, 3, 3, 1, 8), 27 * 1)
    p["conv1_b"] = uniform(ks[1], (8,), 27 * 1)
    p["conv2_w"] = uniform(ks[2], (3, 3, 3, 8, 16), 27 * 8)
    p["conv2_b"] = uniform(ks[3], (16,), 27 * 8)
    p["conv3_w"] = uniform(ks[4], (3, 3, 3, 16, 32), 27 * 16)
    p["conv3_b"] = uniform(ks[5], (32,), 27 * 16)
    # FC layers (stored as (in, out); biases as (1, out) rows).
    p["env_w"] = uniform(ks[6], (32, 64), 32)
    p["env_b"] = uniform(ks[7], (1, 64), 32)
    p["pos_w"] = uniform(ks[8], (4, 64), 4)
    p["pos_b"] = uniform(ks[9], (1, 64), 4)
    c1_w = uniform(ks[10], (128, 64), 128)
    p["c1_w_env"] = c1_w[:64]
    p["c1_w_cam"] = c1_w[64:]
    p["c1_b"] = uniform(ks[11], (1, 64), 128)
    p["c2_w"] = uniform(ks[12], (64, n_actions), 64)
    p["c2_b"] = uniform(ks[13], (1, n_actions), 64)
    return p


# ------------------------------ reference ---------------------------------- #

def reference_forward(params, obstacle_state, camera_state):
    x = obstacle_state
    for wname, bname in [("conv1_w", "conv1_b"),
                         ("conv2_w", "conv2_b"),
                         ("conv3_w", "conv3_b")]:
        x = lax.conv_general_dilated(
            x, params[wname], window_strides=(2, 2, 2),
            padding=[(1, 1)] * 3,
            dimension_numbers=("NDHWC", "DHWIO", "NDHWC"))
        x = jnp.maximum(x + params[bname], 0.0)
    env = x.reshape(x.shape[0], -1)
    env_h = jnp.maximum(env @ params["env_w"] + params["env_b"], 0.0)
    cam_h = jnp.maximum(camera_state @ params["pos_w"] + params["pos_b"], 0.0)
    h = jnp.concatenate([env_h, cam_h], axis=1)
    w1 = jnp.concatenate([params["c1_w_env"], params["c1_w_cam"]], axis=0)
    h = jnp.maximum(h @ w1 + params["c1_b"], 0.0)
    return h @ params["c2_w"] + params["c2_b"]


# ------------------------------- main --------------------------------------- #

if __name__ == "__main__":
    n_actions = 6
    batch = 2

    key = jax.random.PRNGKey(0)
    k_param, k_obs, k_cam = jax.random.split(key, 3)

    params = init_params(k_param, n_actions)
    # Occupancy grid (B, 1, 8, 8, 8) in PyTorch NCDHW terms -> NDHWC here.
    obstacle_state = jax.random.uniform(k_obs, (batch, 8, 8, 8, 1), jnp.float32)
    camera_state = jax.random.normal(k_cam, (batch, 4), jnp.float32)

    # One-time weight preparation (conv -> matmul lowering, padding).
    fused = prepare_fused_params(params, n_actions)

    fwd = jax.jit(functools.partial(dqn_forward, n_actions=n_actions))
    out = jax.block_until_ready(fwd(fused, obstacle_state, camera_state))

    ref = reference_forward(params, obstacle_state, camera_state)
    assert out.shape == (batch, n_actions), out.shape
    assert jnp.allclose(out, ref, rtol=1e-3, atol=1e-3), (out, ref)

    print("KERNEL_OK")
</pallas_src>

<mosaic_0001>
module attributes {stable_mosaic.version = 11 : i64} {
  func.func @fused_dqn_kernel(%arg0: i32, %arg1: memref<8x512xf32, #tpu.memory_space<vmem>>, %arg2: memref<8x8xf32, #tpu.memory_space<vmem>>, %arg3: memref<512x512xf32, #tpu.memory_space<vmem>>, %arg4: memref<1x512xf32, #tpu.memory_space<vmem>>, %arg5: memref<512x128xf32, #tpu.memory_space<vmem>>, %arg6: memref<1x128xf32, #tpu.memory_space<vmem>>, %arg7: memref<128x32xf32, #tpu.memory_space<vmem>>, %arg8: memref<1x32xf32, #tpu.memory_space<vmem>>, %arg9: memref<32x64xf32, #tpu.memory_space<vmem>>, %arg10: memref<1x64xf32, #tpu.memory_space<vmem>>, %arg11: memref<8x64xf32, #tpu.memory_space<vmem>>, %arg12: memref<1x64xf32, #tpu.memory_space<vmem>>, %arg13: memref<64x64xf32, #tpu.memory_space<vmem>>, %arg14: memref<64x64xf32, #tpu.memory_space<vmem>>, %arg15: memref<1x64xf32, #tpu.memory_space<vmem>>, %arg16: memref<64x128xf32, #tpu.memory_space<vmem>>, %arg17: memref<1x128xf32, #tpu.memory_space<vmem>>, %arg18: memref<8x128xf32, #tpu.memory_space<vmem>>) attributes {dimension_semantics = [#tpu.dimension_semantics<parallel>], iteration_bounds = array<i64: 1>, scalar_prefetch = 0 : i64, scratch_operands = 0 : i64, tpu.core_type = #tpu.core_type<tc>, window_params = [{transform_indices = @transform_0, window_bounds = array<i64: 8, 512>}, {transform_indices = @transform_1, window_bounds = array<i64: 8, 8>}, {pipeline_mode = #tpu.pipeline_mode<synchronous>, transform_indices = @transform_2, window_bounds = array<i64: 512, 512>}, {pipeline_mode = #tpu.pipeline_mode<synchronous>, transform_indices = @transform_3, window_bounds = array<i64: 1, 512>}, {pipeline_mode = #tpu.pipeline_mode<synchronous>, transform_indices = @transform_4, window_bounds = array<i64: 512, 128>}, {pipeline_mode = #tpu.pipeline_mode<synchronous>, transform_indices = @transform_5, window_bounds = array<i64: 1, 128>}, {pipeline_mode = #tpu.pipeline_mode<synchronous>, transform_indices = @transform_6, window_bounds = array<i64: 128, 32>}, {pipeline_mode = #tpu.pipeline_mode<synchronous>, transform_indices = @transform_7, window_bounds = array<i64: 1, 32>}, {pipeline_mode = #tpu.pipeline_mode<synchronous>, transform_indices = @transform_8, window_bounds = array<i64: 32, 64>}, {pipeline_mode = #tpu.pipeline_mode<synchronous>, transform_indices = @transform_9, window_bounds = array<i64: 1, 64>}, {pipeline_mode = #tpu.pipeline_mode<synchronous>, transform_indices = @transform_10, window_bounds = array<i64: 8, 64>}, {pipeline_mode = #tpu.pipeline_mode<synchronous>, transform_indices = @transform_11, window_bounds = array<i64: 1, 64>}, {pipeline_mode = #tpu.pipeline_mode<synchronous>, transform_indices = @transform_12, window_bounds = array<i64: 64, 64>}, {pipeline_mode = #tpu.pipeline_mode<synchronous>, transform_indices = @transform_13, window_bounds = array<i64: 64, 64>}, {pipeline_mode = #tpu.pipeline_mode<synchronous>, transform_indices = @transform_14, window_bounds = array<i64: 1, 64>}, {pipeline_mode = #tpu.pipeline_mode<synchronous>, transform_indices = @transform_15, window_bounds = array<i64: 64, 128>}, {pipeline_mode = #tpu.pipeline_mode<synchronous>, transform_indices = @transform_16, window_bounds = array<i64: 1, 128>}, {transform_indices = @transform_17, window_bounds = array<i64: 8, 128>}]} {
    %c0 = arith.constant 0 : index
    %c0_0 = arith.constant 0 : index
    %0 = vector.load %arg1[%c0, %c0_0] : memref<8x512xf32, #tpu.memory_space<vmem>>, vector<8x512xf32>
    %c0_1 = arith.constant 0 : index
    %c0_2 = arith.constant 0 : index
    %1 = vector.load %arg3[%c0_1, %c0_2] : memref<512x512xf32, #tpu.memory_space<vmem>>, vector<512x512xf32>
    %cst = arith.constant dense<0.000000e+00> : vector<8x512xf32>
    %2 = tpu.matmul %0, %1, %cst {dimension_numbers = #tpu.dot_dimension_numbers<[1], [0], [0], [1], [0, 0, 1, 1], [], []>} : vector<8x512xf32>, vector<512x512xf32>, vector<8x512xf32> -> vector<8x512xf32>
    %c0_3 = arith.constant 0 : index
    %c0_4 = arith.constant 0 : index
    %3 = vector.load %arg4[%c0_3, %c0_4] : memref<1x512xf32, #tpu.memory_space<vmem>>, vector<1x512xf32>
    %4 = vector.broadcast %3 : vector<1x512xf32> to vector<8x512xf32>
    %5 = arith.addf %2, %4 : vector<8x512xf32>
    %cst_5 = arith.constant 0.000000e+00 : f32
    %6 = vector.broadcast %cst_5 : f32 to vector<8x512xf32>
    %7 = arith.maximumf %5, %6 : vector<8x512xf32>
    %c0_6 = arith.constant 0 : index
    %c0_7 = arith.constant 0 : index
    %8 = vector.load %arg5[%c0_6, %c0_7] : memref<512x128xf32, #tpu.memory_space<vmem>>, vector<512x128xf32>
    %cst_8 = arith.constant dense<0.000000e+00> : vector<8x128xf32>
    %9 = tpu.matmul %7, %8, %cst_8 {dimension_numbers = #tpu.dot_dimension_numbers<[1], [0], [0], [1], [0, 0, 1, 1], [], []>} : vector<8x512xf32>, vector<512x128xf32>, vector<8x128xf32> -> vector<8x128xf32>
    %c0_9 = arith.constant 0 : index
    %c0_10 = arith.constant 0 : index
    %10 = vector.load %arg6[%c0_9, %c0_10] : memref<1x128xf32, #tpu.memory_space<vmem>>, vector<1x128xf32>
    %11 = vector.broadcast %10 : vector<1x128xf32> to vector<8x128xf32>
    %12 = arith.addf %9, %11 : vector<8x128xf32>
    %cst_11 = arith.constant 0.000000e+00 : f32
    %13 = vector.broadcast %cst_11 : f32 to vector<8x128xf32>
    %14 = arith.maximumf %12, %13 : vector<8x128xf32>
    %c0_12 = arith.constant 0 : index
    %c0_13 = arith.constant 0 : index
    %15 = vector.load %arg7[%c0_12, %c0_13] : memref<128x32xf32, #tpu.memory_space<vmem>>, vector<128x32xf32>
    %cst_14 = arith.constant dense<0.000000e+00> : vector<8x32xf32>
    %16 = tpu.matmul %14, %15, %cst_14 {dimension_numbers = #tpu.dot_dimension_numbers<[1], [0], [0], [1], [0, 0, 1, 1], [], []>} : vector<8x128xf32>, vector<128x32xf32>, vector<8x32xf32> -> vector<8x32xf32>
    %c0_15 = arith.constant 0 : index
    %c0_16 = arith.constant 0 : index
    %17 = vector.load %arg8[%c0_15, %c0_16] : memref<1x32xf32, #tpu.memory_space<vmem>>, vector<1x32xf32>
    %18 = vector.broadcast %17 : vector<1x32xf32> to vector<8x32xf32>
    %19 = arith.addf %16, %18 : vector<8x32xf32>
    %cst_17 = arith.constant 0.000000e+00 : f32
    %20 = vector.broadcast %cst_17 : f32 to vector<8x32xf32>
    %21 = arith.maximumf %19, %20 : vector<8x32xf32>
    %c0_18 = arith.constant 0 : index
    %c0_19 = arith.constant 0 : index
    %22 = vector.load %arg9[%c0_18, %c0_19] : memref<32x64xf32, #tpu.memory_space<vmem>>, vector<32x64xf32>
    %cst_20 = arith.constant dense<0.000000e+00> : vector<8x64xf32>
    %23 = tpu.matmul %21, %22, %cst_20 {dimension_numbers = #tpu.dot_dimension_numbers<[1], [0], [0], [1], [0, 0, 1, 1], [], []>} : vector<8x32xf32>, vector<32x64xf32>, vector<8x64xf32> -> vector<8x64xf32>
    %c0_21 = arith.constant 0 : index
    %c0_22 = arith.constant 0 : index
    %24 = vector.load %arg10[%c0_21, %c0_22] : memref<1x64xf32, #tpu.memory_space<vmem>>, vector<1x64xf32>
    %25 = vector.broadcast %24 : vector<1x64xf32> to vector<8x64xf32>
    %26 = arith.addf %23, %25 : vector<8x64xf32>
    %cst_23 = arith.constant 0.000000e+00 : f32
    %27 = vector.broadcast %cst_23 : f32 to vector<8x64xf32>
    %28 = arith.maximumf %26, %27 : vector<8x64xf32>
    %c0_24 = arith.constant 0 : index
    %c0_25 = arith.constant 0 : index
    %29 = vector.load %arg2[%c0_24, %c0_25] : memref<8x8xf32, #tpu.memory_space<vmem>>, vector<8x8xf32>
    %c0_26 = arith.constant 0 : index
    %c0_27 = arith.constant 0 : index
    %30 = vector.load %arg11[%c0_26, %c0_27] : memref<8x64xf32, #tpu.memory_space<vmem>>, vector<8x64xf32>
    %cst_28 = arith.constant dense<0.000000e+00> : vector<8x64xf32>
    %31 = tpu.matmul %29, %30, %cst_28 {dimension_numbers = #tpu.dot_dimension_numbers<[1], [0], [0], [1], [0, 0, 1, 1], [], []>} : vector<8x8xf32>, vector<8x64xf32>, vector<8x64xf32> -> vector<8x64xf32>
    %c0_29 = arith.constant 0 : index
    %c0_30 = arith.constant 0 : index
    %32 = vector.load %arg12[%c0_29, %c0_30] : memref<1x64xf32, #tpu.memory_space<vmem>>, vector<1x64xf32>
    %33 = vector.broadcast %32 : vector<1x64xf32> to vector<8x64xf32>
    %34 = arith.addf %31, %33 : vector<8x64xf32>
    %cst_31 = arith.constant 0.000000e+00 : f32
    %35 = vector.broadcast %cst_31 : f32 to vector<8x64xf32>
    %36 = arith.maximumf %34, %35 : vector<8x64xf32>
    %c0_32 = arith.constant 0 : index
    %c0_33 = arith.constant 0 : index
    %37 = vector.load %arg13[%c0_32, %c0_33] : memref<64x64xf32, #tpu.memory_space<vmem>>, vector<64x64xf32>
    %cst_34 = arith.constant dense<0.000000e+00> : vector<8x64xf32>
    %38 = tpu.matmul %28, %37, %cst_34 {dimension_numbers = #tpu.dot_dimension_numbers<[1], [0], [0], [1], [0, 0, 1, 1], [], []>} : vector<8x64xf32>, vector<64x64xf32>, vector<8x64xf32> -> vector<8x64xf32>
    %c0_35 = arith.constant 0 : index
    %c0_36 = arith.constant 0 : index
    %39 = vector.load %arg14[%c0_35, %c0_36] : memref<64x64xf32, #tpu.memory_space<vmem>>, vector<64x64xf32>
    %cst_37 = arith.constant dense<0.000000e+00> : vector<8x64xf32>
    %40 = tpu.matmul %36, %39, %cst_37 {dimension_numbers = #tpu.dot_dimension_numbers<[1], [0], [0], [1], [0, 0, 1, 1], [], []>} : vector<8x64xf32>, vector<64x64xf32>, vector<8x64xf32> -> vector<8x64xf32>
    %41 = arith.addf %38, %40 : vector<8x64xf32>
    %c0_38 = arith.constant 0 : index
    %c0_39 = arith.constant 0 : index
    %42 = vector.load %arg15[%c0_38, %c0_39] : memref<1x64xf32, #tpu.memory_space<vmem>>, vector<1x64xf32>
    %43 = vector.broadcast %42 : vector<1x64xf32> to vector<8x64xf32>
    %44 = arith.addf %41, %43 : vector<8x64xf32>
    %cst_40 = arith.constant 0.000000e+00 : f32
    %45 = vector.broadcast %cst_40 : f32 to vector<8x64xf32>
    %46 = arith.maximumf %44, %45 : vector<8x64xf32>
    %c0_41 = arith.constant 0 : index
    %c0_42 = arith.constant 0 : index
    %47 = vector.load %arg16[%c0_41, %c0_42] : memref<64x128xf32, #tpu.memory_space<vmem>>, vector<64x128xf32>
    %cst_43 = arith.constant dense<0.000000e+00> : vector<8x128xf32>
    %48 = tpu.matmul %46, %47, %cst_43 {dimension_numbers = #tpu.dot_dimension_numbers<[1], [0], [0], [1], [0, 0, 1, 1], [], []>} : vector<8x64xf32>, vector<64x128xf32>, vector<8x128xf32> -> vector<8x128xf32>
    %c0_44 = arith.constant 0 : index
    %c0_45 = arith.constant 0 : index
    %49 = vector.load %arg17[%c0_44, %c0_45] : memref<1x128xf32, #tpu.memory_space<vmem>>, vector<1x128xf32>
    %50 = vector.broadcast %49 : vector<1x128xf32> to vector<8x128xf32>
    %51 = arith.addf %48, %50 : vector<8x128xf32>
    %c0_46 = arith.constant 0 : index
    %c0_47 = arith.constant 0 : index
    %52 = vector.load %arg18[%c0_46, %c0_47] : memref<8x128xf32, #tpu.memory_space<vmem>>, vector<8x128xf32>
    tpu.vector_store %arg18[%c0_46, %c0_47], %51 {strides = array<i32>} : memref<8x128xf32, #tpu.memory_space<vmem>>, vector<8x128xf32>,
    return
  }
  func.func @transform_0(%arg0: i32) -> (i32, i32) {
    %c0_i32 = arith.constant 0 : i32
    %c0_i32_0 = arith.constant 0 : i32
    return %arg0, %c0_i32 : i32, i32
  }
  func.func @transform_1(%arg0: i32) -> (i32, i32) {
    %c0_i32 = arith.constant 0 : i32
    %c0_i32_0 = arith.constant 0 : i32
    return %arg0, %c0_i32 : i32, i32
  }
  func.func @transform_2(%arg0: i32) -> (i32, i32) {
    %c0_i32 = arith.constant 0 : i32
    %c0_i32_0 = arith.constant 0 : i32
    %c0_i32_1 = arith.constant 0 : i32
    return %c0_i32, %c0_i32_0 : i32, i32
  }
  func.func @transform_3(%arg0: i32) -> (i32, i32) {
    %c0_i32 = arith.constant 0 : i32
    %c0_i32_0 = arith.constant 0 : i32
    %c0_i32_1 = arith.constant 0 : i32
    return %c0_i32, %c0_i32_0 : i32, i32
  }
  func.func @transform_4(%arg0: i32) -> (i32, i32) {
    %c0_i32 = arith.constant 0 : i32
    %c0_i32_0 = arith.constant 0 : i32
    %c0_i32_1 = arith.constant 0 : i32
    return %c0_i32, %c0_i32_0 : i32, i32
  }
  func.func @transform_5(%arg0: i32) -> (i32, i32) {
    %c0_i32 = arith.constant 0 : i32
    %c0_i32_0 = arith.constant 0 : i32
    %c0_i32_1 = arith.constant 0 : i32
    return %c0_i32, %c0_i32_0 : i32, i32
  }
  func.func @transform_6(%arg0: i32) -> (i32, i32) {
    %c0_i32 = arith.constant 0 : i32
    %c0_i32_0 = arith.constant 0 : i32
    %c0_i32_1 = arith.constant 0 : i32
    return %c0_i32, %c0_i32_0 : i32, i32
  }
  func.func @transform_7(%arg0: i32) -> (i32, i32) {
    %c0_i32 = arith.constant 0 : i32
    %c0_i32_0 = arith.constant 0 : i32
    %c0_i32_1 = arith.constant 0 : i32
    return %c0_i32, %c0_i32_0 : i32, i32
  }
  func.func @transform_8(%arg0: i32) -> (i32, i32) {
    %c0_i32 = arith.constant 0 : i32
    %c0_i32_0 = arith.constant 0 : i32
    %c0_i32_1 = arith.constant 0 : i32
    return %c0_i32, %c0_i32_0 : i32, i32
  }
  func.func @transform_9(%arg0: i32) -> (i32, i32) {
    %c0_i32 = arith.constant 0 : i32
    %c0_i32_0 = arith.constant 0 : i32
    %c0_i32_1 = arith.constant 0 : i32
    return %c0_i32, %c0_i32_0 : i32, i32
  }
  func.func @transform_10(%arg0: i32) -> (i32, i32) {
    %c0_i32 = arith.constant 0 : i32
    %c0_i32_0 = arith.constant 0 : i32
    %c0_i32_1 = arith.constant 0 : i32
    return %c0_i32, %c0_i32_0 : i32, i32
  }
  func.func @transform_11(%arg0: i32) -> (i32, i32) {
    %c0_i32 = arith.constant 0 : i32
    %c0_i32_0 = arith.constant 0 : i32
    %c0_i32_1 = arith.constant 0 : i32
    return %c0_i32, %c0_i32_0 : i32, i32
  }
  func.func @transform_12(%arg0: i32) -> (i32, i32) {
    %c0_i32 = arith.constant 0 : i32
    %c0_i32_0 = arith.constant 0 : i32
    %c0_i32_1 = arith.constant 0 : i32
    return %c0_i32, %c0_i32_0 : i32, i32
  }
  func.func @transform_13(%arg0: i32) -> (i32, i32) {
    %c0_i32 = arith.constant 0 : i32
    %c0_i32_0 = arith.constant 0 : i32
    %c0_i32_1 = arith.constant 0 : i32
    return %c0_i32, %c0_i32_0 : i32, i32
  }
  func.func @transform_14(%arg0: i32) -> (i32, i32) {
    %c0_i32 = arith.constant 0 : i32
    %c0_i32_0 = arith.constant 0 : i32
    %c0_i32_1 = arith.constant 0 : i32
    return %c0_i32, %c0_i32_0 : i32, i32
  }
  func.func @transform_15(%arg0: i32) -> (i32, i32) {
    %c0_i32 = arith.constant 0 : i32
    %c0_i32_0 = arith.constant 0 : i32
    %c0_i32_1 = arith.constant 0 : i32
    return %c0_i32, %c0_i32_0 : i32, i32
  }
  func.func @transform_16(%arg0: i32) -> (i32, i32) {
    %c0_i32 = arith.constant 0 : i32
    %c0_i32_0 = arith.constant 0 : i32
    %c0_i32_1 = arith.constant 0 : i32
    return %c0_i32, %c0_i32_0 : i32, i32
  }
  func.func @transform_17(%arg0: i32) -> (i32, i32) {
    %c0_i32 = arith.constant 0 : i32
    %c0_i32_0 = arith.constant 0 : i32
    return %arg0, %c0_i32 : i32, i32
  }
}

</mosaic_0001>

<bundles_post_ra>
// kernel: dqn_forward.1
= control target key start
LH: loop header
LB: loop body
LE: loop exit
PB: predicated region body
PF: predicated region fallthrough
CT: control target
= control target key end

     0   :  { %s1425_s0 = inlined_call_operand.vmem [shape: f32[8,512], index: 0, kind: input, shape index: {}]   ;;  %s1426_s1 = inlined_call_operand.vmem [shape: f32[8,8], index: 1, kind: input, shape index: {}]   ;;  %s1427_s2 = inlined_call_operand.hbm [shape: f32[512,512], index: 2, kind: input, shape index: {}]   ;;  %s1428_s3 = inlined_call_operand.vmem [shape: f32[1,512], index: 3, kind: input, shape index: {}]   ;;  %s1429_s4 = inlined_call_operand.hbm [shape: f32[512,128], index: 4, kind: input, shape index: {}]   ;;  %s1430_s5 = inlined_call_operand.vmem [shape: f32[1,128], index: 5, kind: input, shape index: {}]   ;;  %s1431_s6 = inlined_call_operand.vmem [shape: f32[128,32], index: 6, kind: input, shape index: {}]   ;;  %s1432_s7 = inlined_call_operand.vmem [shape: f32[1,32], index: 7, kind: input, shape index: {}]   ;;  %s1433_s8 = inlined_call_operand.vmem [shape: f32[32,64], index: 8, kind: input, shape index: {}]   ;;  %s1434_s9 = inlined_call_operand.vmem [shape: f32[1,64], index: 9, kind: input, shape index: {}]   ;;  %s1435_s10 = inlined_call_operand.vmem [shape: f32[8,64], index: 10, kind: input, shape index: {}]   ;;  %s1436_s11 = inlined_call_operand.vmem [shape: f32[1,64], index: 11, kind: input, shape index: {}]   ;;  %s1437_s12 = inlined_call_operand.vmem [shape: f32[64,64], index: 12, kind: input, shape index: {}]   ;;  %s1438_s13 = inlined_call_operand.vmem [shape: f32[64,64], index: 13, kind: input, shape index: {}]   ;;  %s1439_s14 = inlined_call_operand.vmem [shape: f32[1,64], index: 14, kind: input, shape index: {}]   ;;  %s1440_s15 = inlined_call_operand.vmem [shape: f32[64,128], index: 15, kind: input, shape index: {}]   ;;  %s1441_s16 = inlined_call_operand.vmem [shape: f32[1,128], index: 16, kind: input, shape index: {}]   ;;  %s1442_s17 = inlined_call_operand.vmem [shape: f32[8,128], index: 17, kind: output, shape index: {}]  }
   0x1   :  { %1444 = sst [smem:[#allocation8_spill]] %s1425_s0 }
   0x2   :  { %1445 = sst [smem:[#allocation9_spill]] %s1426_s1 }
   0x3   :  { %22 = vsyncpa [#allocation3], 0  ;;  %s32_s26 = sshll.u32 %s1427_s2, 4  ;;  %s33_s26 = int_to_ptr.hbm [resolvable:$true] %s32_s26 }
   0x4   :  { %23 = vsyncpa [#allocation5], 0  ;;  %s1116_s27 = smov [#allocation2]   ;;  %s47_s30 = sshll.u32 %s1429_s4, 4  ;;  %s48_s30 = int_to_ptr.hbm [resolvable:$true] %s47_s30 }
   0x5   :  { %s34_s28 = sshll.u32 %s1116_s27, 4  ;;  %s1117_s18 = smov 512   ;;  %s35_s28 = int_to_ptr.vmem [resolvable:$true] %s34_s28 }
   0x6   :  { %s1118_s19 = smov 32   ;;  %s1119_s1 = smov [#allocation4]  }
   0x7   :  { %40 = dma.hbm_to_vmem [thread:$0]  %s33_s26, 32768, %s35_s28, [#allocation3], %s1117_s18, %s1117_s18, %s1118_s19  }
   0x8   :  { %s49_s20 = sshll.u32 %s1119_s1, 4  ;;  %s1120_s21 = smov 128   ;;  %s50_s20 = int_to_ptr.vmem [resolvable:$true] %s49_s20 }
   0x9   :  { %s1121_s22 = smov 8  }
   0xa   :  { %55 = dma.hbm_to_vmem [thread:$0]  %s48_s30, 8192, %s50_s20, [#allocation5], %s1120_s21, %s1120_s21, %s1121_s22  }
   0xb   :  { %1112 = dma.done.wait [#allocation3], 32768  }
   0xc   :  { %1113 = vsyncadd [#allocation3], 4294934528 }
   0xd   :  { %1114 = dma.done.wait [#allocation5], 8192  }
   0xe   :  { %1115 = vsyncadd [#allocation5], 4294959104  ;;  %v280_v0 = vld [vmem:[#allocation2 + $0x5e0] sm:$0xff]  ;;  %v281_v62 = vld [vmem:[#allocation2 + $0x5e8] sm:$0xff]  ;;  %s1446_s23 = sld [smem:[#allocation8_spill]]  ;;  %vm911_vm0 = vcmask 64512  }
   0xf   :  { %v152_v1 = vld [vmem:[#allocation2 + $0x1e0] sm:$0xff]  ;;  %398 = vmatpush.msra.mxu2 %v280_v0  ;;  %v153_v0 = vld [vmem:[#allocation2 + $0x1e8] sm:$0xff]  ;;  %vm952_vm1 = vcmask 523264   ;;  %vm880_vm2 = vcmask 261120  }
  0x10   :  { %v276_v2 = vld [vmem:[#allocation2 + $0x5c0] sm:$0xff]  ;;  %358 = vmatpush.msra.mxu0 %v152_v1  ;;  %v345_v1 = vld [vmem:[#allocation2 + $0x7e8] sm:$0xff] }
  0x11   :  { %v344_v3 = vld [vmem:[#allocation2 + $0x7e0] sm:$0xff]  ;;  %399 = vmatpush.msra.mxu2 %v276_v2  ;;  %v277_v2 = vld [vmem:[#allocation2 + $0x5c8] sm:$0xff] }
  0x12   :  { %v148_v4 = vld [vmem:[#allocation2 + $0x1c0] sm:$0xff]  ;;  %418 = vmatpush.msra.mxu3 %v344_v3 }
  0x13   :  { %v216_v5 = vld [vmem:[#allocation2 + $0x3e0] sm:$0xff]  ;;  %359 = vmatpush.msra.mxu0 %v148_v4  ;;  %v149_v4 = vld [vmem:[#allocation2 + $0x1c8] sm:$0xff] }
  0x14   :  { %378 = vmatpush.msra.mxu1 %v216_v5  ;;  %v272_v6 = vld [vmem:[#allocation2 + $0x5a0] sm:$0xff]  ;;  %v217_v5 = vld [vmem:[#allocation2 + $0x3e8] sm:$0xff] }
  0x15   :  { %v340_v7 = vld [vmem:[#allocation2 + $0x7c0] sm:$0xff]  ;;  %400 = vmatpush.msra.mxu2 %v272_v6  ;;  %v273_v6 = vld [vmem:[#allocation2 + $0x5a8] sm:$0xff] }
  0x16   :  { %v144_v8 = vld [vmem:[#allocation2 + $0x1a0] sm:$0xff]  ;;  %419 = vmatpush.msra.mxu3 %v340_v7  ;;  %v341_v7 = vld [vmem:[#allocation2 + $0x7c8] sm:$0xff] }
  0x17   :  { %v212_v9 = vld [vmem:[#allocation2 + $0x3c0] sm:$0xff]  ;;  %360 = vmatpush.msra.mxu0 %v144_v8  ;;  %v145_v8 = vld [vmem:[#allocation2 + $0x1a8] sm:$0xff] }
  0x18   :  { %v336_v10 = vld [vmem:[#allocation2 + $0x7a0] sm:$0xff]  ;;  %379 = vmatpush.msra.mxu1 %v212_v9  ;;  %v213_v9 = vld [vmem:[#allocation2 + $0x3c8] sm:$0xff] }
  0x19   :  { %v268_v11 = vld [vmem:[#allocation2 + $0x580] sm:$0xff]  ;;  %420 = vmatpush.msra.mxu3 %v336_v10  ;;  %v269_v10 = vld [vmem:[#allocation2 + $0x588] sm:$0xff] }
  0x1a   :  { %v140_v12 = vld [vmem:[#allocation2 + $0x180] sm:$0xff]  ;;  %401 = vmatpush.msra.mxu2 %v268_v11  ;;  %v337_v11 = vld [vmem:[#allocation2 + $0x7a8] sm:$0xff] }
  0x1b   :  { %v208_v13 = vld [vmem:[#allocation2 + $0x3a0] sm:$0xff]  ;;  %361 = vmatpush.msra.mxu0 %v140_v12  ;;  %v141_v12 = vld [vmem:[#allocation2 + $0x188] sm:$0xff] }
  0x1c   :  { %v332_v14 = vld [vmem:[#allocation2 + $0x780] sm:$0xff]  ;;  %380 = vmatpush.msra.mxu1 %v208_v13  ;;  %v209_v13 = vld [vmem:[#allocation2 + $0x3a8] sm:$0xff] }
  0x1d   :  { %v204_v15 = vld [vmem:[#allocation2 + $0x380] sm:$0xff]  ;;  %421 = vmatpush.msra.mxu3 %v332_v14  ;;  %v265_v14 = vld [vmem:[#allocation2 + $0x568] sm:$0xff] }
  0x1e   :  { %v264_v16 = vld [vmem:[#allocation2 + $0x560] sm:$0xff]  ;;  %381 = vmatpush.msra.mxu1 %v204_v15  ;;  %v333_v15 = vld [vmem:[#allocation2 + $0x788] sm:$0xff] }
  0x1f   :  { %v136_v17 = vld [vmem:[#allocation2 + $0x160] sm:$0xff]  ;;  %402 = vmatpush.msra.mxu2 %v264_v16  ;;  %v137_v16 = vld [vmem:[#allocation2 + $0x168] sm:$0xff] }
  0x20   :  { %v328_v18 = vld [vmem:[#allocation2 + $0x760] sm:$0xff]  ;;  %362 = vmatpush.msra.mxu0 %v136_v17  ;;  %v205_v17 = vld [vmem:[#allocation2 + $0x388] sm:$0xff] }
  0x21   :  { %v200_v19 = vld [vmem:[#allocation2 + $0x360] sm:$0xff]  ;;  %422 = vmatpush.msra.mxu3 %v328_v18  ;;  %v261_v18 = vld [vmem:[#allocation2 + $0x548] sm:$0xff] }
  0x22   :  { %v260_v20 = vld [vmem:[#allocation2 + $0x540] sm:$0xff]  ;;  %382 = vmatpush.msra.mxu1 %v200_v19  ;;  %v329_v19 = vld [vmem:[#allocation2 + $0x768] sm:$0xff] }
  0x23   :  { %v132_v21 = vld [vmem:[#allocation2 + $0x140] sm:$0xff]  ;;  %403 = vmatpush.msra.mxu2 %v260_v20  ;;  %v133_v20 = vld [vmem:[#allocation2 + $0x148] sm:$0xff] }
  0x24   :  { %v324_v22 = vld [vmem:[#allocation2 + $0x740] sm:$0xff]  ;;  %363 = vmatpush.msra.mxu0 %v132_v21  ;;  %v201_v21 = vld [vmem:[#allocation2 + $0x368] sm:$0xff] }
  0x25   :  { %v196_v23 = vld [vmem:[#allocation2 + $0x340] sm:$0xff]  ;;  %423 = vmatpush.msra.mxu3 %v324_v22  ;;  %v257_v22 = vld [vmem:[#allocation2 + $0x528] sm:$0xff] }
  0x26   :  { %v256_v24 = vld [vmem:[#allocation2 + $0x520] sm:$0xff]  ;;  %383 = vmatpush.msra.mxu1 %v196_v23  ;;  %v325_v23 = vld [vmem:[#allocation2 + $0x748] sm:$0xff] }
  0x27   :  { %v128_v25 = vld [vmem:[#allocation2 + $0x120] sm:$0xff]  ;;  %404 = vmatpush.msra.mxu2 %v256_v24  ;;  %v129_v24 = vld [vmem:[#allocation2 + $0x128] sm:$0xff] }
  0x28   :  { %v320_v26 = vld [vmem:[#allocation2 + $0x720] sm:$0xff]  ;;  %364 = vmatpush.msra.mxu0 %v128_v25  ;;  %v197_v25 = vld [vmem:[#allocation2 + $0x348] sm:$0xff] }
  0x29   :  { %v192_v27 = vld [vmem:[#allocation2 + $0x320] sm:$0xff]  ;;  %424 = vmatpush.msra.mxu3 %v320_v26  ;;  %v253_v26 = vld [vmem:[#allocation2 + $0x508] sm:$0xff] }
  0x2a   :  { %v252_v28 = vld [vmem:[#allocation2 + $0x500] sm:$0xff]  ;;  %384 = vmatpush.msra.mxu1 %v192_v27  ;;  %v321_v27 = vld [vmem:[#allocation2 + $0x728] sm:$0xff] }
  0x2b   :  { %v124_v29 = vld [vmem:[#allocation2 + $0x100] sm:$0xff]  ;;  %405 = vmatpush.msra.mxu2 %v252_v28  ;;  %v125_v28 = vld [vmem:[#allocation2 + $0x108] sm:$0xff] }
  0x2c   :  { %v316_v30 = vld [vmem:[#allocation2 + $0x700] sm:$0xff]  ;;  %365 = vmatpush.msra.mxu0 %v124_v29  ;;  %v193_v29 = vld [vmem:[#allocation2 + $0x328] sm:$0xff] }
  0x2d   :  { %v188_v31 = vld [vmem:[#allocation2 + $0x300] sm:$0xff]  ;;  %425 = vmatpush.msra.mxu3 %v316_v30  ;;  %v249_v30 = vld [vmem:[#allocation2 + $0x4e8] sm:$0xff] }
  0x2e   :  { %v248_v32 = vld [vmem:[#allocation2 + $0x4e0] sm:$0xff]  ;;  %385 = vmatpush.msra.mxu1 %v188_v31  ;;  %v317_v31 = vld [vmem:[#allocation2 + $0x708] sm:$0xff] }
  0x2f   :  { %v120_v33 = vld [vmem:[#allocation2 + $0xe0] sm:$0xff]  ;;  %406 = vmatpush.msra.mxu2 %v248_v32  ;;  %v121_v32 = vld [vmem:[#allocation2 + $0xe8] sm:$0xff] }
  0x30   :  { %v312_v34 = vld [vmem:[#allocation2 + $0x6e0] sm:$0xff]  ;;  %366 = vmatpush.msra.mxu0 %v120_v33  ;;  %v189_v33 = vld [vmem:[#allocation2 + $0x308] sm:$0xff] }
  0x31   :  { %v184_v35 = vld [vmem:[#allocation2 + $0x2e0] sm:$0xff]  ;;  %426 = vmatpush.msra.mxu3 %v312_v34  ;;  %v245_v34 = vld [vmem:[#allocation2 + $0x4c8] sm:$0xff] }
  0x32   :  { %v244_v36 = vld [vmem:[#allocation2 + $0x4c0] sm:$0xff]  ;;  %386 = vmatpush.msra.mxu1 %v184_v35  ;;  %v313_v35 = vld [vmem:[#allocation2 + $0x6e8] sm:$0xff] }
  0x33   :  { %v116_v37 = vld [vmem:[#allocation2 + $0xc0] sm:$0xff]  ;;  %407 = vmatpush.msra.mxu2 %v244_v36  ;;  %v117_v36 = vld [vmem:[#allocation2 + $0xc8] sm:$0xff] }
  0x34   :  { %v308_v38 = vld [vmem:[#allocation2 + $0x6c0] sm:$0xff]  ;;  %367 = vmatpush.msra.mxu0 %v116_v37  ;;  %v185_v37 = vld [vmem:[#allocation2 + $0x2e8] sm:$0xff] }
  0x35   :  { %v180_v39 = vld [vmem:[#allocation2 + $0x2c0] sm:$0xff]  ;;  %427 = vmatpush.msra.mxu3 %v308_v38  ;;  %v241_v38 = vld [vmem:[#allocation2 + $0x4a8] sm:$0xff] }
  0x36   :  { %v240_v40 = vld [vmem:[#allocation2 + $0x4a0] sm:$0xff]  ;;  %387 = vmatpush.msra.mxu1 %v180_v39  ;;  %v309_v39 = vld [vmem:[#allocation2 + $0x6c8] sm:$0xff] }
  0x37   :  { %v112_v41 = vld [vmem:[#allocation2 + $0xa0] sm:$0xff]  ;;  %408 = vmatpush.msra.mxu2 %v240_v40  ;;  %v113_v40 = vld [vmem:[#allocation2 + $0xa8] sm:$0xff] }
  0x38   :  { %v304_v42 = vld [vmem:[#allocation2 + $0x6a0] sm:$0xff]  ;;  %368 = vmatpush.msra.mxu0 %v112_v41  ;;  %v181_v41 = vld [vmem:[#allocation2 + $0x2c8] sm:$0xff] }
  0x39   :  { %v176_v43 = vld [vmem:[#allocation2 + $0x2a0] sm:$0xff]  ;;  %428 = vmatpush.msra.mxu3 %v304_v42  ;;  %v237_v42 = vld [vmem:[#allocation2 + $0x488] sm:$0xff] }
  0x3a   :  { %v236_v44 = vld [vmem:[#allocation2 + $0x480] sm:$0xff]  ;;  %388 = vmatpush.msra.mxu1 %v176_v43  ;;  %v305_v43 = vld [vmem:[#allocation2 + $0x6a8] sm:$0xff] }
  0x3b   :  { %v108_v45 = vld [vmem:[#allocation2 + $0x80] sm:$0xff]  ;;  %409 = vmatpush.msra.mxu2 %v236_v44  ;;  %v109_v44 = vld [vmem:[#allocation2 + $0x88] sm:$0xff] }
  0x3c   :  { %v300_v46 = vld [vmem:[#allocation2 + $0x680] sm:$0xff]  ;;  %369 = vmatpush.msra.mxu0 %v108_v45  ;;  %v177_v45 = vld [vmem:[#allocation2 + $0x2a8] sm:$0xff] }
  0x3d   :  { %v172_v47 = vld [vmem:[#allocation2 + $0x280] sm:$0xff]  ;;  %429 = vmatpush.msra.mxu3 %v300_v46  ;;  %v233_v46 = vld [vmem:[#allocation2 + $0x468] sm:$0xff] }
  0x3e   :  { %v232_v48 = vld [vmem:[#allocation2 + $0x460] sm:$0xff]  ;;  %389 = vmatpush.msra.mxu1 %v172_v47  ;;  %v301_v47 = vld [vmem:[#allocation2 + $0x688] sm:$0xff] }
  0x3f   :  { %v104_v49 = vld [vmem:[#allocation2 + $0x60] sm:$0xff]  ;;  %410 = vmatpush.msra.mxu2 %v232_v48  ;;  %v1221_v48 = vld [vmem:[%s1446_s23 + $0x10] sm:$0xff] }
  0x40   :  { %v296_v50 = vld [vmem:[#allocation2 + $0x660] sm:$0xff]  ;;  %370 = vmatpush.msra.mxu0 %v104_v49  ;;  %v105_v49 = vld [vmem:[#allocation2 + $0x68] sm:$0xff] }
  0x41   :  { %v168_v51 = vld [vmem:[#allocation2 + $0x260] sm:$0xff]  ;;  %430 = vmatpush.msra.mxu3 %v296_v50  ;;  %v173_v50 = vld [vmem:[#allocation2 + $0x288] sm:$0xff] }
  0x42   :  { %v228_v52 = vld [vmem:[#allocation2 + $0x440] sm:$0xff]  ;;  %390 = vmatpush.msra.mxu1 %v168_v51  ;;  %v229_v51 = vld [vmem:[#allocation2 + $0x448] sm:$0xff] }
  0x43   :  { %v100_v53 = vld [vmem:[#allocation2 + $0x40] sm:$0xff]  ;;  %411 = vmatpush.msra.mxu2 %v228_v52  ;;  %v297_v52 = vld [vmem:[#allocation2 + $0x668] sm:$0xff] }
  0x44   :  { %v292_v54 = vld [vmem:[#allocation2 + $0x640] sm:$0xff]  ;;  %371 = vmatpush.msra.mxu0 %v100_v53 }
  0x45   :  { %v164_v55 = vld [vmem:[#allocation2 + $0x240] sm:$0xff]  ;;  %431 = vmatpush.msra.mxu3 %v292_v54  ;;  %v1232_v54 = vld [vmem:[%s1446_s23 + $0x18] sm:$0xff] }
  0x46   :  { %v224_v56 = vld [vmem:[#allocation2 + $0x420] sm:$0xff]  ;;  %391 = vmatpush.msra.mxu1 %v164_v55  ;;  %v101_v55 = vld [vmem:[#allocation2 + $0x48] sm:$0xff] }
  0x47   :  { %v96_v57 = vld [vmem:[#allocation2 + $0x20] sm:$0xff]  ;;  %412 = vmatpush.msra.mxu2 %v224_v56  ;;  %v169_v56 = vld [vmem:[#allocation2 + $0x268] sm:$0xff] }
  0x48   :  { %v288_v58 = vld [vmem:[#allocation2 + $0x620] sm:$0xff]  ;;  %372 = vmatpush.msra.mxu0 %v96_v57  ;;  %v225_v57 = vld [vmem:[#allocation2 + $0x428] sm:$0xff] }
  0x49   :  { %v160_v59 = vld [vmem:[#allocation2 + $0x220] sm:$0xff]  ;;  %432 = vmatpush.msra.mxu3 %v288_v58  ;;  %v293_v58 = vld [vmem:[#allocation2 + $0x648] sm:$0xff] }
  0x4a   :  { %v220_v60 = vld [vmem:[#allocation2 + $0x400] sm:$0xff]  ;;  %392 = vmatpush.msra.mxu1 %v160_v59  ;;  %v1238_v59 = vld [vmem:[%s1446_s23 + $0x8] sm:$0xff] }
  0x4b   :  { %v92_v61 = vld [vmem:[#allocation2] sm:$0xff]  ;;  %413 = vmatpush.msra.mxu2 %v220_v60  ;;  %v97_v60 = vld [vmem:[#allocation2 + $0x28] sm:$0xff] }
  0x4c   :  { %v284_v63 = vld [vmem:[#allocation2 + $0x600] sm:$0xff]  ;;  %373 = vmatpush.msra.mxu0 %v92_v61  ;;  %414 = vmatmul.f32.vlgmr.msra.gmra.mxu2 %v1221_v48  ;;  %v165_v61 = vld [vmem:[#allocation2 + $0x248] sm:$0xff] }
  0x4d   :  { %v156_v3 = vld [vmem:[#allocation2 + $0x200] sm:$0xff]  ;;  %478 = vmatpush.msrb.mxu2 %v281_v62  ;;  %433 = vmatpush.msra.mxu3 %v284_v63  ;;  %v221_v62 = vld [vmem:[#allocation2 + $0x408] sm:$0xff] }
  0x4e   :  { %438 = vmatpush.msrb.mxu0 %v153_v0  ;;  %393 = vmatpush.msra.mxu1 %v156_v3  ;;  %v1226_v53 = vld [vmem:[%s1446_s23] sm:$0xff]  ;;  %v289_v63 = vld [vmem:[#allocation2 + $0x628] sm:$0xff]  ;;  %v282_v0 = vld [vmem:[#allocation2 + $0x5f0] sm:$0xff] }
  0x4f   :  { %498 = vmatpush.msrb.mxu3 %v345_v1  ;;  %479 = vmatpush.msrb.mxu2 %v277_v2  ;;  %v93_v1 = vld [vmem:[#allocation2 + $0x8] sm:$0xff] }
  0x50   :  { %439 = vmatpush.msrb.mxu0 %v149_v4  ;;  %458 = vmatpush.msrb.mxu1 %v217_v5  ;;  %v161_v2 = vld [vmem:[#allocation2 + $0x228] sm:$0xff]  ;;  %v154_v4 = vld [vmem:[#allocation2 + $0x1f0] sm:$0xff] }
  0x51   :  { %480 = vmatpush.msrb.mxu2 %v273_v6  ;;  %499 = vmatpush.msrb.mxu3 %v341_v7  ;;  %v285_v3 = vld [vmem:[#allocation2 + $0x608] sm:$0xff]  ;;  %v278_v5 = vld [vmem:[#allocation2 + $0x5d0] sm:$0xff] }
  0x52   :  { %440 = vmatpush.msrb.mxu0 %v145_v8  ;;  %459 = vmatpush.msrb.mxu1 %v213_v9  ;;  %v346_v6 = vld [vmem:[#allocation2 + $0x7f0] sm:$0xff]  ;;  %v157_v7 = vld [vmem:[#allocation2 + $0x208] sm:$0xff] }
  0x53   :  { %481 = vmatpush.msrb.mxu2 %v269_v10  ;;  %500 = vmatpush.msrb.mxu3 %v337_v11  ;;  %v150_v8 = vld [vmem:[#allocation2 + $0x1d0] sm:$0xff] }
  0x54   :  { %441 = vmatpush.msrb.mxu0 %v141_v12  ;;  %460 = vmatpush.msrb.mxu1 %v209_v13  ;;  %v218_v9 = vld [vmem:[#allocation2 + $0x3f0] sm:$0xff] }
  0x55   :  { %482 = vmatpush.msrb.mxu2 %v265_v14  ;;  %501 = vmatpush.msrb.mxu3 %v333_v15  ;;  %v274_v10 = vld [vmem:[#allocation2 + $0x5b0] sm:$0xff] }
  0x56   :  { %442 = vmatpush.msrb.mxu0 %v137_v16  ;;  %461 = vmatpush.msrb.mxu1 %v205_v17  ;;  %v342_v11 = vld [vmem:[#allocation2 + $0x7d0] sm:$0xff] }
  0x57   :  { %483 = vmatpush.msrb.mxu2 %v261_v18  ;;  %502 = vmatpush.msrb.mxu3 %v329_v19  ;;  %v146_v12 = vld [vmem:[#allocation2 + $0x1b0] sm:$0xff] }
  0x58   :  { %443 = vmatpush.msrb.mxu0 %v133_v20  ;;  %462 = vmatpush.msrb.mxu1 %v201_v21  ;;  %v214_v13 = vld [vmem:[#allocation2 + $0x3d0] sm:$0xff] }
  0x59   :  { %484 = vmatpush.msrb.mxu2 %v257_v22  ;;  %503 = vmatpush.msrb.mxu3 %v325_v23  ;;  %v270_v14 = vld [vmem:[#allocation2 + $0x590] sm:$0xff] }
  0x5a   :  { %444 = vmatpush.msrb.mxu0 %v129_v24  ;;  %463 = vmatpush.msrb.mxu1 %v197_v25  ;;  %v338_v15 = vld [vmem:[#allocation2 + $0x7b0] sm:$0xff] }
  0x5b   :  { %485 = vmatpush.msrb.mxu2 %v253_v26  ;;  %504 = vmatpush.msrb.mxu3 %v321_v27  ;;  %v142_v16 = vld [vmem:[#allocation2 + $0x190] sm:$0xff] }
  0x5c   :  { %445 = vmatpush.msrb.mxu0 %v125_v28  ;;  %464 = vmatpush.msrb.mxu1 %v193_v29  ;;  %v210_v17 = vld [vmem:[#allocation2 + $0x3b0] sm:$0xff] }
  0x5d   :  { %486 = vmatpush.msrb.mxu2 %v249_v30  ;;  %505 = vmatpush.msrb.mxu3 %v317_v31  ;;  %v266_v18 = vld [vmem:[#allocation2 + $0x570] sm:$0xff] }
  0x5e   :  { %446 = vmatpush.msrb.mxu0 %v121_v32  ;;  %465 = vmatpush.msrb.mxu1 %v189_v33  ;;  %v334_v19 = vld [vmem:[#allocation2 + $0x790] sm:$0xff] }
  0x5f   :  { %487 = vmatpush.msrb.mxu2 %v245_v34  ;;  %506 = vmatpush.msrb.mxu3 %v313_v35  ;;  %v138_v20 = vld [vmem:[#allocation2 + $0x170] sm:$0xff] }
  0x60   :  { %447 = vmatpush.msrb.mxu0 %v117_v36  ;;  %466 = vmatpush.msrb.mxu1 %v185_v37  ;;  %v206_v21 = vld [vmem:[#allocation2 + $0x390] sm:$0xff] }
  0x61   :  { %488 = vmatpush.msrb.mxu2 %v241_v38  ;;  %507 = vmatpush.msrb.mxu3 %v309_v39  ;;  %v262_v22 = vld [vmem:[#allocation2 + $0x550] sm:$0xff] }
  0x62   :  { %448 = vmatpush.msrb.mxu0 %v113_v40  ;;  %467 = vmatpush.msrb.mxu1 %v181_v41  ;;  %v330_v23 = vld [vmem:[#allocation2 + $0x770] sm:$0xff] }
  0x63   :  { %489 = vmatpush.msrb.mxu2 %v237_v42  ;;  %508 = vmatpush.msrb.mxu3 %v305_v43  ;;  %v134_v24 = vld [vmem:[#allocation2 + $0x150] sm:$0xff] }
  0x64   :  { %449 = vmatpush.msrb.mxu0 %v109_v44  ;;  %468 = vmatpush.msrb.mxu1 %v177_v45  ;;  %v202_v25 = vld [vmem:[#allocation2 + $0x370] sm:$0xff] }
  0x65   :  { %490 = vmatpush.msrb.mxu2 %v233_v46  ;;  %509 = vmatpush.msrb.mxu3 %v301_v47  ;;  %v258_v26 = vld [vmem:[#allocation2 + $0x530] sm:$0xff] }
  0x66   :  { %450 = vmatpush.msrb.mxu0 %v105_v49  ;;  %469 = vmatpush.msrb.mxu1 %v173_v50  ;;  %v326_v27 = vld [vmem:[#allocation2 + $0x750] sm:$0xff] }
  0x67   :  { %491 = vmatpush.msrb.mxu2 %v229_v51  ;;  %510 = vmatpush.msrb.mxu3 %v297_v52  ;;  %v130_v28 = vld [vmem:[#allocation2 + $0x130] sm:$0xff] }
  0x68   :  { %374 = vmatmul.f32.vlgmr.msra.gmra.mxu0 %v1226_v53  ;;  %434 = vmatmul.f32.vlgmr.msra.gmra.mxu3 %v1232_v54  ;;  %v198_v29 = vld [vmem:[#allocation2 + $0x350] sm:$0xff] }
  0x69   :  { %451 = vmatpush.msrb.mxu0 %v101_v55  ;;  %470 = vmatpush.msrb.mxu1 %v169_v56  ;;  %v254_v30 = vld [vmem:[#allocation2 + $0x510] sm:$0xff] }
  0x6a   :  { %492 = vmatpush.msrb.mxu2 %v225_v57  ;;  %511 = vmatpush.msrb.mxu3 %v293_v58  ;;  %v322_v31 = vld [vmem:[#allocation2 + $0x730] sm:$0xff] }
  0x6b   :  { %394 = vmatmul.f32.vlgmr.msra.gmra.mxu1 %v1238_v59  ;;  %452 = vmatpush.msrb.mxu0 %v97_v60  ;;  %v126_v32 = vld [vmem:[#allocation2 + $0x110] sm:$0xff] }
  0x6c   :  { %471 = vmatpush.msrb.mxu1 %v165_v61  ;;  %493 = vmatpush.msrb.mxu2 %v221_v62  ;;  %v194_v33 = vld [vmem:[#allocation2 + $0x330] sm:$0xff] }
  0x6d   :  { %512 = vmatpush.msrb.mxu3 %v289_v63  ;;  %453 = vmatpush.msrb.mxu0 %v93_v1  ;;  %v250_v34 = vld [vmem:[#allocation2 + $0x4f0] sm:$0xff] }
  0x6e   :  { %558 = vmatpush.msra.mxu2 %v282_v0  ;;  %472 = vmatpush.msrb.mxu1 %v161_v2  ;;  %v318_v35 = vld [vmem:[#allocation2 + $0x710] sm:$0xff] }
  0x6f   :  { %513 = vmatpush.msrb.mxu3 %v285_v3  ;;  %494 = vmatmul.f32.vlgmr.msrb.gmra.mxu2 %v1221_v48  ;;  %v122_v36 = vld [vmem:[#allocation2 + $0xf0] sm:$0xff] }
  0x70   :  { %518 = vmatpush.msra.mxu0 %v154_v4  ;;  %559 = vmatpush.msra.mxu2 %v278_v5  ;;  %v190_v37 = vld [vmem:[#allocation2 + $0x310] sm:$0xff]  ;;  %v283_v5 = vld [vmem:[#allocation2 + $0x5f8] sm:$0xff] }
  0x71   :  { %578 = vmatpush.msra.mxu3 %v346_v6  ;;  %473 = vmatpush.msrb.mxu1 %v157_v7  ;;  %v246_v38 = vld [vmem:[#allocation2 + $0x4d0] sm:$0xff] }
  0x72   :  { %454 = vmatmul.f32.vlgmr.msrb.gmra.mxu0 %v1226_v53  ;;  %514 = vmatmul.f32.vlgmr.msrb.gmra.mxu3 %v1232_v54  ;;  %v314_v39 = vld [vmem:[#allocation2 + $0x6f0] sm:$0xff] }
  0x73   :  { %519 = vmatpush.msra.mxu0 %v150_v8  ;;  %538 = vmatpush.msra.mxu1 %v218_v9  ;;  %v118_v40 = vld [vmem:[#allocation2 + $0xd0] sm:$0xff]  ;;  %v155_v8 = vld [vmem:[#allocation2 + $0x1f8] sm:$0xff] }
  0x74   :  { %560 = vmatpush.msra.mxu2 %v274_v10  ;;  %579 = vmatpush.msra.mxu3 %v342_v11  ;;  %v186_v41 = vld [vmem:[#allocation2 + $0x2f0] sm:$0xff]  ;;  %v279_v9 = vld [vmem:[#allocation2 + $0x5d8] sm:$0xff] }
  0x75   :  { %474 = vmatmul.f32.vlgmr.msrb.gmra.mxu1 %v1238_v59  ;;  %520 = vmatpush.msra.mxu0 %v146_v12  ;;  %v242_v42 = vld [vmem:[#allocation2 + $0x4b0] sm:$0xff]  ;;  %v347_v10 = vld [vmem:[#allocation2 + $0x7f8] sm:$0xff] }
  0x76   :  { %539 = vmatpush.msra.mxu1 %v214_v13  ;;  %561 = vmatpush.msra.mxu2 %v270_v14  ;;  %v310_v43 = vld [vmem:[#allocation2 + $0x6d0] sm:$0xff]  ;;  %v151_v12 = vld [vmem:[#allocation2 + $0x1d8] sm:$0xff] }
  0x77   :  { %580 = vmatpush.msra.mxu3 %v338_v15  ;;  %521 = vmatpush.msra.mxu0 %v142_v16  ;;  %v114_v44 = vld [vmem:[#allocation2 + $0xb0] sm:$0xff]  ;;  %v275_v13 = vld [vmem:[#allocation2 + $0x5b8] sm:$0xff] }
  0x78   :  { %540 = vmatpush.msra.mxu1 %v210_v17  ;;  %562 = vmatpush.msra.mxu2 %v266_v18  ;;  %v182_v45 = vld [vmem:[#allocation2 + $0x2d0] sm:$0xff]  ;;  %v219_v14 = vld [vmem:[#allocation2 + $0x3f8] sm:$0xff] }
  0x79   :  { %581 = vmatpush.msra.mxu3 %v334_v19  ;;  %522 = vmatpush.msra.mxu0 %v138_v20  ;;  %v238_v46 = vld [vmem:[#allocation2 + $0x490] sm:$0xff]  ;;  %v343_v15 = vld [vmem:[#allocation2 + $0x7d8] sm:$0xff] }
  0x7a   :  { %541 = vmatpush.msra.mxu1 %v206_v21  ;;  %563 = vmatpush.msra.mxu2 %v262_v22  ;;  %v306_v47 = vld [vmem:[#allocation2 + $0x6b0] sm:$0xff]  ;;  %v147_v16 = vld [vmem:[#allocation2 + $0x1b8] sm:$0xff] }
  0x7b   :  { %582 = vmatpush.msra.mxu3 %v330_v23  ;;  %523 = vmatpush.msra.mxu0 %v134_v24  ;;  %v110_v49 = vld [vmem:[#allocation2 + $0x90] sm:$0xff]  ;;  %v271_v17 = vld [vmem:[#allocation2 + $0x598] sm:$0xff] }
  0x7c   :  { %542 = vmatpush.msra.mxu1 %v202_v25  ;;  %564 = vmatpush.msra.mxu2 %v258_v26  ;;  %v178_v50 = vld [vmem:[#allocation2 + $0x2b0] sm:$0xff]  ;;  %v215_v18 = vld [vmem:[#allocation2 + $0x3d8] sm:$0xff] }
  0x7d   :  { %583 = vmatpush.msra.mxu3 %v326_v27  ;;  %524 = vmatpush.msra.mxu0 %v130_v28  ;;  %v234_v51 = vld [vmem:[#allocation2 + $0x470] sm:$0xff]  ;;  %v339_v19 = vld [vmem:[#allocation2 + $0x7b8] sm:$0xff] }
  0x7e   :  { %543 = vmatpush.msra.mxu1 %v198_v29  ;;  %565 = vmatpush.msra.mxu2 %v254_v30  ;;  %v302_v52 = vld [vmem:[#allocation2 + $0x690] sm:$0xff]  ;;  %v143_v20 = vld [vmem:[#allocation2 + $0x198] sm:$0xff] }
  0x7f   :  { %584 = vmatpush.msra.mxu3 %v322_v31  ;;  %525 = vmatpush.msra.mxu0 %v126_v32  ;;  %v106_v55 = vld [vmem:[#allocation2 + $0x70] sm:$0xff]  ;;  %v267_v21 = vld [vmem:[#allocation2 + $0x578] sm:$0xff] }
  0x80   :  { %544 = vmatpush.msra.mxu1 %v194_v33  ;;  %566 = vmatpush.msra.mxu2 %v250_v34  ;;  %v174_v56 = vld [vmem:[#allocation2 + $0x290] sm:$0xff]  ;;  %v211_v22 = vld [vmem:[#allocation2 + $0x3b8] sm:$0xff] }
  0x81   :  { %585 = vmatpush.msra.mxu3 %v318_v35  ;;  %526 = vmatpush.msra.mxu0 %v122_v36  ;;  %v230_v57 = vld [vmem:[#allocation2 + $0x450] sm:$0xff]  ;;  %v335_v23 = vld [vmem:[#allocation2 + $0x798] sm:$0xff] }
  0x82   :  { %545 = vmatpush.msra.mxu1 %v190_v37  ;;  %567 = vmatpush.msra.mxu2 %v246_v38  ;;  %v298_v58 = vld [vmem:[#allocation2 + $0x670] sm:$0xff]  ;;  %v139_v24 = vld [vmem:[#allocation2 + $0x178] sm:$0xff] }
  0x83   :  { %586 = vmatpush.msra.mxu3 %v314_v39  ;;  %527 = vmatpush.msra.mxu0 %v118_v40  ;;  %v102_v60 = vld [vmem:[#allocation2 + $0x50] sm:$0xff]  ;;  %v263_v25 = vld [vmem:[#allocation2 + $0x558] sm:$0xff] }
  0x84   :  { %546 = vmatpush.msra.mxu1 %v186_v41  ;;  %568 = vmatpush.msra.mxu2 %v242_v42  ;;  %v170_v61 = vld [vmem:[#allocation2 + $0x270] sm:$0xff]  ;;  %v207_v26 = vld [vmem:[#allocation2 + $0x398] sm:$0xff] }
  0x85   :  { %587 = vmatpush.msra.mxu3 %v310_v43  ;;  %528 = vmatpush.msra.mxu0 %v114_v44  ;;  %v226_v62 = vld [vmem:[#allocation2 + $0x430] sm:$0xff]  ;;  %v331_v27 = vld [vmem:[#allocation2 + $0x778] sm:$0xff] }
  0x86   :  { %547 = vmatpush.msra.mxu1 %v182_v45  ;;  %569 = vmatpush.msra.mxu2 %v238_v46  ;;  %v294_v63 = vld [vmem:[#allocation2 + $0x650] sm:$0xff]  ;;  %v135_v28 = vld [vmem:[#allocation2 + $0x158] sm:$0xff] }
  0x87   :  { %588 = vmatpush.msra.mxu3 %v306_v47  ;;  %529 = vmatpush.msra.mxu0 %v110_v49  ;;  %v98_v0 = vld [vmem:[#allocation2 + $0x30] sm:$0xff]  ;;  %v259_v29 = vld [vmem:[#allocation2 + $0x538] sm:$0xff] }
  0x88   :  { %548 = vmatpush.msra.mxu1 %v178_v50  ;;  %570 = vmatpush.msra.mxu2 %v234_v51  ;;  %v166_v1 = vld [vmem:[#allocation2 + $0x250] sm:$0xff]  ;;  %v203_v30 = vld [vmem:[#allocation2 + $0x378] sm:$0xff] }
  0x89   :  { %589 = vmatpush.msra.mxu3 %v302_v52  ;;  %530 = vmatpush.msra.mxu0 %v106_v55  ;;  %v222_v2 = vld [vmem:[#allocation2 + $0x410] sm:$0xff]  ;;  %v327_v31 = vld [vmem:[#allocation2 + $0x758] sm:$0xff] }
  0x8a   :  { %549 = vmatpush.msra.mxu1 %v174_v56  ;;  %571 = vmatpush.msra.mxu2 %v230_v57  ;;  %v290_v3 = vld [vmem:[#allocation2 + $0x630] sm:$0xff]  ;;  %v131_v32 = vld [vmem:[#allocation2 + $0x138] sm:$0xff] }
  0x8b   :  { %590 = vmatpush.msra.mxu3 %v298_v58  ;;  %531 = vmatpush.msra.mxu0 %v102_v60  ;;  %v94_v4 = vld [vmem:[#allocation2 + $0x10] sm:$0xff]  ;;  %v255_v33 = vld [vmem:[#allocation2 + $0x518] sm:$0xff] }
  0x8c   :  { %550 = vmatpush.msra.mxu1 %v170_v61  ;;  %572 = vmatpush.msra.mxu2 %v226_v62  ;;  %v162_v6 = vld [vmem:[#allocation2 + $0x230] sm:$0xff]  ;;  %v199_v34 = vld [vmem:[#allocation2 + $0x358] sm:$0xff] }
  0x8d   :  { %591 = vmatpush.msra.mxu3 %v294_v63  ;;  %532 = vmatpush.msra.mxu0 %v98_v0  ;;  %v286_v7 = vld [vmem:[#allocation2 + $0x610] sm:$0xff]  ;;  %v323_v35 = vld [vmem:[#allocation2 + $0x738] sm:$0xff] }
  0x8e   :  { %551 = vmatpush.msra.mxu1 %v166_v1  ;;  %573 = vmatpush.msra.mxu2 %v222_v2  ;;  %v158_v11 = vld [vmem:[#allocation2 + $0x210] sm:$0xff]  ;;  %v127_v36 = vld [vmem:[#allocation2 + $0x118] sm:$0xff] }
  0x8f   :  { %592 = vmatpush.msra.mxu3 %v290_v3  ;;  %574 = vmatmul.f32.vlgmr.msra.gmra.mxu2 %v1221_v48  ;;  %v251_v37 = vld [vmem:[#allocation2 + $0x4f8] sm:$0xff] }
  0x90   :  { %533 = vmatpush.msra.mxu0 %v94_v4  ;;  %638 = vmatpush.msrb.mxu2 %v283_v5  ;;  %v195_v38 = vld [vmem:[#allocation2 + $0x338] sm:$0xff] }
  0x91   :  { %552 = vmatpush.msra.mxu1 %v162_v6  ;;  %593 = vmatpush.msra.mxu3 %v286_v7  ;;  %v319_v39 = vld [vmem:[#allocation2 + $0x718] sm:$0xff] }
  0x92   :  { %534 = vmatmul.f32.vlgmr.msra.gmra.mxu0 %v1226_v53  ;;  %594 = vmatmul.f32.vlgmr.msra.gmra.mxu3 %v1232_v54  ;;  %v123_v40 = vld [vmem:[#allocation2 + $0xf8] sm:$0xff] }
  0x93   :  { %598 = vmatpush.msrb.mxu0 %v155_v8  ;;  %639 = vmatpush.msrb.mxu2 %v279_v9  ;;  %v247_v41 = vld [vmem:[#allocation2 + $0x4d8] sm:$0xff] }
  0x94   :  { %658 = vmatpush.msrb.mxu3 %v347_v10  ;;  %553 = vmatpush.msra.mxu1 %v158_v11  ;;  %v191_v42 = vld [vmem:[#allocation2 + $0x318] sm:$0xff] }
  0x95   :  { %599 = vmatpush.msrb.mxu0 %v151_v12  ;;  %554 = vmatmul.f32.vlgmr.msra.gmra.mxu1 %v1238_v59  ;;  %v315_v43 = vld [vmem:[#allocation2 + $0x6f8] sm:$0xff] }
  0x96   :  { %640 = vmatpush.msrb.mxu2 %v275_v13  ;;  %618 = vmatpush.msrb.mxu1 %v219_v14  ;;  %v119_v44 = vld [vmem:[#allocation2 + $0xd8] sm:$0xff]  ;;  %v696_v13 = vld [vmem:[#allocation4 + $0x70] sm:$0xff] }
  0x97   :  { %659 = vmatpush.msrb.mxu3 %v343_v15  ;;  %600 = vmatpush.msrb.mxu0 %v147_v16  ;;  %v243_v45 = vld [vmem:[#allocation2 + $0x4b8] sm:$0xff]  ;;  %v695_v15 = vld [vmem:[#allocation4 + $0x68] sm:$0xff]  ;;  %v712_v16 = vld [vmem:[#allocation4 + $0xf0] sm:$0xff] }
  0x98   :  { %641 = vmatpush.msrb.mxu2 %v271_v17  ;;  %619 = vmatpush.msrb.mxu1 %v215_v18  ;;  %v187_v46 = vld [vmem:[#allocation2 + $0x2f8] sm:$0xff]  ;;  %v711_v17 = vld [vmem:[#allocation4 + $0xe8] sm:$0xff] }
  0x99   :  { %660 = vmatpush.msrb.mxu3 %v339_v19  ;;  %601 = vmatpush.msrb.mxu0 %v143_v20  ;;  %v311_v47 = vld [vmem:[#allocation2 + $0x6d8] sm:$0xff]  ;;  %v710_v19 = vld [vmem:[#allocation4 + $0xe0] sm:$0xff]  ;;  %v691_v20 = vld [vmem:[#allocation4 + $0x48] sm:$0xff] }
  0x9a   :  { %642 = vmatpush.msrb.mxu2 %v267_v21  ;;  %620 = vmatpush.msrb.mxu1 %v211_v22  ;;  %v115_v49 = vld [vmem:[#allocation2 + $0xb8] sm:$0xff]  ;;  %v708_v21 = vld [vmem:[#allocation4 + $0xd0] sm:$0xff]  ;;  %v707_v22 = vld [vmem:[#allocation4 + $0xc8] sm:$0xff] }
  0x9b   :  { %661 = vmatpush.msrb.mxu3 %v335_v23  ;;  %602 = vmatpush.msrb.mxu0 %v139_v24  ;;  %v239_v50 = vld [vmem:[#allocation2 + $0x498] sm:$0xff]  ;;  %v706_v24 = vld [vmem:[#allocation4 + $0xc0] sm:$0xff] }
  0x9c   :  { %643 = vmatpush.msrb.mxu2 %v263_v25  ;;  %621 = vmatpush.msrb.mxu1 %v207_v26  ;;  %v183_v51 = vld [vmem:[#allocation2 + $0x2d8] sm:$0xff]  ;;  %v688_v25 = vld [vmem:[#allocation4 + $0x30] sm:$0xff] }
  0x9d   :  { %662 = vmatpush.msrb.mxu3 %v331_v27  ;;  %603 = vmatpush.msrb.mxu0 %v135_v28  ;;  %v307_v52 = vld [vmem:[#allocation2 + $0x6b8] sm:$0xff]  ;;  %v687_v27 = vld [vmem:[#allocation4 + $0x28] sm:$0xff]  ;;  %v704_v28 = vld [vmem:[#allocation4 + $0xb0] sm:$0xff] }
  0x9e   :  { %644 = vmatpush.msrb.mxu2 %v259_v29  ;;  %622 = vmatpush.msrb.mxu1 %v203_v30  ;;  %v111_v55 = vld [vmem:[#allocation2 + $0x98] sm:$0xff]  ;;  %v686_v29 = vld [vmem:[#allocation4 + $0x20] sm:$0xff]  ;;  %v703_v30 = vld [vmem:[#allocation4 + $0xa8] sm:$0xff] }
  0x9f   :  { %663 = vmatpush.msrb.mxu3 %v327_v31  ;;  %604 = vmatpush.msrb.mxu0 %v131_v32  ;;  %v235_v56 = vld [vmem:[#allocation2 + $0x478] sm:$0xff]  ;;  %v702_v32 = vld [vmem:[#allocation4 + $0xa0] sm:$0xff] }
  0xa0   :  { %645 = vmatpush.msrb.mxu2 %v255_v33  ;;  %623 = vmatpush.msrb.mxu1 %v199_v34  ;;  %v179_v57 = vld [vmem:[#allocation2 + $0x2b8] sm:$0xff]  ;;  %v684_v33 = vld [vmem:[#allocation4 + $0x10] sm:$0xff] }
  0xa1   :  { %664 = vmatpush.msrb.mxu3 %v323_v35  ;;  %605 = vmatpush.msrb.mxu0 %v127_v36  ;;  %v303_v58 = vld [vmem:[#allocation2 + $0x698] sm:$0xff]  ;;  %v683_v35 = vld [vmem:[#allocation4 + $0x8] sm:$0xff]  ;;  %v700_v36 = vld [vmem:[#allocation4 + $0x90] sm:$0xff] }
  0xa2   :  { %646 = vmatpush.msrb.mxu2 %v251_v37  ;;  %624 = vmatpush.msrb.mxu1 %v195_v38  ;;  %v107_v60 = vld [vmem:[#allocation2 + $0x78] sm:$0xff]  ;;  %v682_v37 = vld [vmem:[#allocation4] sm:$0xff]  ;;  %v699_v38 = vld [vmem:[#allocation4 + $0x88] sm:$0xff] }
  0xa3   :  { %665 = vmatpush.msrb.mxu3 %v319_v39  ;;  %606 = vmatpush.msrb.mxu0 %v123_v40  ;;  %v231_v61 = vld [vmem:[#allocation2 + $0x458] sm:$0xff]  ;;  %v698_v40 = vld [vmem:[#allocation4 + $0x80] sm:$0xff] }
  0xa4   :  { %647 = vmatpush.msrb.mxu2 %v247_v41  ;;  %625 = vmatpush.msrb.mxu1 %v191_v42  ;;  %v175_v62 = vld [vmem:[#allocation2 + $0x298] sm:$0xff]  ;;  %v728_v41 = vld [vmem:[#allocation4 + $0x170] sm:$0xff]  ;;  %v727_v42 = vld [vmem:[#allocation4 + $0x168] sm:$0xff] }
  0xa5   :  { %666 = vmatpush.msrb.mxu3 %v315_v43  ;;  %607 = vmatpush.msrb.mxu0 %v119_v44  ;;  %v299_v63 = vld [vmem:[#allocation2 + $0x678] sm:$0xff]  ;;  %v726_v43 = vld [vmem:[#allocation4 + $0x160] sm:$0xff] }
  0xa6   :  { %648 = vmatpush.msrb.mxu2 %v243_v45  ;;  %626 = vmatpush.msrb.mxu1 %v187_v46  ;;  %v103_v0 = vld [vmem:[#allocation2 + $0x58] sm:$0xff]  ;;  %v1257_v44 = vld [vmem:[%s1428_s3] sm:$0xf]  ;;  %s1447_s3 = sld [smem:[#allocation9_spill]] }
  0xa7   :  { %667 = vmatpush.msrb.mxu3 %v311_v47  ;;  %608 = vmatpush.msrb.mxu0 %v115_v49  ;;  %v227_v1 = vld [vmem:[#allocation2 + $0x438] sm:$0xff]  ;;  %v350_v46 = vperm.slane %v1257_v44, 0  ;;  %v724_v47 = vld [vmem:[#allocation4 + $0x150] sm:$0xff]  ;;  %v723_v49 = vld [vmem:[#allocation4 + $0x148] sm:$0xff] }
  0xa8   :  { %649 = vmatpush.msrb.mxu2 %v239_v50  ;;  %627 = vmatpush.msrb.mxu1 %v183_v51  ;;  %v171_v2 = vld [vmem:[#allocation2 + $0x278] sm:$0xff] }
  0xa9   :  { %668 = vmatpush.msrb.mxu3 %v307_v52  ;;  %609 = vmatpush.msrb.mxu0 %v111_v55  ;;  %v295_v3 = vld [vmem:[#allocation2 + $0x658] sm:$0xff]  ;;  %v722_v52 = vld [vmem:[#allocation4 + $0x140] sm:$0xff] }
  0xaa   :  { %650 = vmatpush.msrb.mxu2 %v235_v56  ;;  %628 = vmatpush.msrb.mxu1 %v179_v57  ;;  %v99_v4 = vld [vmem:[#allocation2 + $0x38] sm:$0xff] }
  0xab   :  { %669 = vmatpush.msrb.mxu3 %v303_v58  ;;  %610 = vmatpush.msrb.mxu0 %v107_v60  ;;  %v223_v5 = vld [vmem:[#allocation2 + $0x418] sm:$0xff]  ;;  %v720_v60 = vld [vmem:[#allocation4 + $0x130] sm:$0xff] }
  0xac   :  { %651 = vmatpush.msrb.mxu2 %v231_v61  ;;  %629 = vmatpush.msrb.mxu1 %v175_v62  ;;  %v167_v6 = vld [vmem:[#allocation2 + $0x258] sm:$0xff] }
  0xad   :  { %670 = vmatpush.msrb.mxu3 %v299_v63  ;;  %611 = vmatpush.msrb.mxu0 %v103_v0  ;;  %v291_v7 = vld [vmem:[#allocation2 + $0x638] sm:$0xff]  ;;  %v351_v63 = vperm.slane %v1257_v44, 1 }
  0xae   :  { %652 = vmatpush.msrb.mxu2 %v227_v1  ;;  %630 = vmatpush.msrb.mxu1 %v171_v2  ;;  %v95_v8 = vld [vmem:[#allocation2 + $0x18] sm:$0xff] }
  0xaf   :  { %671 = vmatpush.msrb.mxu3 %v295_v3  ;;  %612 = vmatpush.msrb.mxu0 %v99_v4  ;;  %v163_v9 = vld [vmem:[#allocation2 + $0x238] sm:$0xff]  ;;  %v719_v4 = vld [vmem:[#allocation4 + $0x128] sm:$0xff] }
  0xb0   :  { %653 = vmatpush.msrb.mxu2 %v223_v5  ;;  %v287_v10 = vld [vmem:[#allocation2 + $0x618] sm:$0xff]  ;;  %631 = vmatpush.msrb.mxu1 %v167_v6 }
  0xb1   :  { %672 = vmatpush.msrb.mxu3 %v291_v7  ;;  %654 = vmatmul.f32.vlgmr.msrb.gmra.mxu2 %v1221_v48  ;;  %v159_v11 = vld [vmem:[#allocation2 + $0x218] sm:$0xff]  ;;  %v694_v48 = vld [vmem:[#allocation4 + $0x60] sm:$0xff] }
  0xb2   :  { %613 = vmatpush.msrb.mxu0 %v95_v8  ;;  %v697_v12 = vld [vmem:[#allocation4 + $0x78] sm:$0xff]  ;;  %632 = vmatpush.msrb.mxu1 %v163_v9  ;;  %v718_v8 = vld [vmem:[#allocation4 + $0x120] sm:$0xff] }
  0xb3   :  { %673 = vmatpush.msrb.mxu3 %v287_v10  ;;  %614 = vmatmul.f32.vlgmr.msrb.gmra.mxu0 %v1226_v53  ;;  %v713_v14 = vld [vmem:[#allocation4 + $0xf8] sm:$0xff]  ;;  %v692_v53 = vld [vmem:[#allocation4 + $0x50] sm:$0xff] }
  0xb4   :  { %674 = vmatmul.f32.vlgmr.msrb.gmra.mxu3 %v1232_v54  ;;  %633 = vmatpush.msrb.mxu1 %v159_v11  ;;  %v693_v18 = vld [vmem:[#allocation4 + $0x58] sm:$0xff] }
  0xb5   :  { %750 = vmatpush.msra.mxu0 %v697_v12  ;;  %634 = vmatmul.f32.vlgmr.msrb.gmra.mxu1 %v1238_v59  ;;  %v709_v54 = vld [vmem:[#allocation4 + $0xd8] sm:$0xff]  ;;  %v690_v59 = vld [vmem:[#allocation4 + $0x40] sm:$0xff] }
  0xb6   :  { %770 = vmatpush.msra.mxu1 %v713_v14  ;;  %v689_v23 = vld [vmem:[#allocation4 + $0x38] sm:$0xff] }
  0xb7   :  { %751 = vmatpush.msra.mxu0 %v696_v13  ;;  %v705_v26 = vld [vmem:[#allocation4 + $0xb8] sm:$0xff]  ;;  %v716_v13 = vld [vmem:[#allocation4 + $0x110] sm:$0xff] }
  0xb8   :  { %771 = vmatpush.msra.mxu1 %v712_v16  ;;  %v685_v31 = vld [vmem:[#allocation4 + $0x18] sm:$0xff]  ;;  %v714_v16 = vld [vmem:[#allocation4 + $0x100] sm:$0xff] }
  0xb9   :  { %752 = vmatpush.msra.mxu0 %v695_v15  ;;  %v701_v34 = vld [vmem:[#allocation4 + $0x98] sm:$0xff]  ;;  %v715_v15 = vld [vmem:[#allocation4 + $0x108] sm:$0xff] }
  0xba   :  { %772 = vmatpush.msra.mxu1 %v711_v17  ;;  %v729_v39 = vld [vmem:[#allocation4 + $0x178] sm:$0xff]  ;;  %v744_v17 = vld [vmem:[#allocation4 + $0x1f0] sm:$0xff] }
  0xbb   :  { %753 = vmatpush.msra.mxu0 %v694_v48  ;;  %790 = vmatpush.msra.mxu2 %v729_v39  ;;  %v725_v45 = vld [vmem:[#allocation4 + $0x158] sm:$0xff]  ;;  %v353_v39 = vperm.slane %v1257_v44, 3 }
  0xbc   :  { %773 = vmatpush.msra.mxu1 %v710_v19  ;;  %v721_v56 = vld [vmem:[#allocation4 + $0x138] sm:$0xff]  ;;  %v742_v19 = vld [vmem:[#allocation4 + $0x1e0] sm:$0xff] }
  0xbd   :  { %754 = vmatpush.msra.mxu0 %v693_v18  ;;  %791 = vmatpush.msra.mxu2 %v728_v41  ;;  %v717_v10 = vld [vmem:[#allocation4 + $0x118] sm:$0xff]  ;;  %v743_v18 = vld [vmem:[#allocation4 + $0x1e8] sm:$0xff] }
  0xbe   :  { %774 = vmatpush.msra.mxu1 %v709_v54  ;;  %v745_v48 = vld [vmem:[#allocation4 + $0x1f8] sm:$0xff]  ;;  %v740_v54 = vld [vmem:[#allocation4 + $0x1d0] sm:$0xff] }
  0xbf   :  { %755 = vmatpush.msra.mxu0 %v692_v53  ;;  %792 = vmatpush.msra.mxu2 %v727_v42  ;;  %v741_v53 = vld [vmem:[#allocation4 + $0x1d8] sm:$0xff] }
  0xc0   :  { %775 = vmatpush.msra.mxu1 %v708_v21  ;;  %810 = vmatpush.msra.mxu3 %v745_v48  ;;  %v738_v21 = vld [vmem:[#allocation4 + $0x1c0] sm:$0xff] }
  0xc1   :  { %756 = vmatpush.msra.mxu0 %v691_v20  ;;  %793 = vmatpush.msra.mxu2 %v726_v43  ;;  %v739_v20 = vld [vmem:[#allocation4 + $0x1c8] sm:$0xff] }
  0xc2   :  { %776 = vmatpush.msra.mxu1 %v707_v22  ;;  %811 = vmatpush.msra.mxu3 %v744_v17  ;;  %v352_v22 = vperm.slane %v1257_v44, 2  ;;  %v844_v44 = vld [vmem:[%s1431_s6 + $0x68] sm:$0xff] }
  0xc3   :  { %757 = vmatpush.msra.mxu0 %v690_v59  ;;  %794 = vmatpush.msra.mxu2 %v725_v45  ;;  %v737_v59 = vld [vmem:[#allocation4 + $0x1b8] sm:$0xff] }
  0xc4   :  { %777 = vmatpush.msra.mxu1 %v706_v24  ;;  %812 = vmatpush.msra.mxu3 %v743_v18  ;;  %v873_v18 = vld [vmem:[%s1433_s8 + $0x8] sm:$0xff] }
  0xc5   :  { %758 = vmatpush.msra.mxu0 %v689_v23  ;;  %795 = vmatpush.msra.mxu2 %v724_v47  ;;  %v736_v23 = vld [vmem:[#allocation4 + $0x1b0] sm:$0xff] }
  0xc6   :  { %778 = vmatpush.msra.mxu1 %v705_v26  ;;  %813 = vmatpush.msra.mxu3 %v742_v19  ;;  %v735_v26 = vld [vmem:[#allocation4 + $0x1a8] sm:$0xff]  ;;  %v872_v19 = vld [vmem:[%s1433_s8] sm:$0xff] }
  0xc7   :  { %759 = vmatpush.msra.mxu0 %v688_v25  ;;  %796 = vmatpush.msra.mxu2 %v723_v49 }
  0xc8   :  { %779 = vmatpush.msra.mxu1 %v704_v28  ;;  %814 = vmatpush.msra.mxu3 %v741_v53  ;;  %v951_v53 = vld [vmem:[%s1438_s13 + $0x38] sm:$0xff] }
  0xc9   :  { %760 = vmatpush.msra.mxu0 %v687_v27  ;;  %797 = vmatpush.msra.mxu2 %v722_v52  ;;  %v734_v27 = vld [vmem:[#allocation4 + $0x1a0] sm:$0xff]  ;;  %v845_v52 = vld [vmem:[%s1431_s6 + $0x70] sm:$0xff] }
  0xca   :  { %780 = vmatpush.msra.mxu1 %v703_v30  ;;  %815 = vmatpush.msra.mxu3 %v740_v54  ;;  %v950_v54 = vld [vmem:[%s1438_s13 + $0x30] sm:$0xff] }
  0xcb   :  { %761 = vmatpush.msra.mxu0 %v686_v29  ;;  %798 = vmatpush.msra.mxu2 %v721_v56  ;;  %v842_v56 = vld [vmem:[%s1431_s6 + $0x58] sm:$0xff] }
  0xcc   :  { %781 = vmatpush.msra.mxu1 %v702_v32  ;;  %816 = vmatpush.msra.mxu3 %v739_v20  ;;  %v943_v20 = vld [vmem:[%s1437_s12 + $0x38] sm:$0xff] }
  0xcd   :  { %762 = vmatpush.msra.mxu0 %v685_v31  ;;  %799 = vmatpush.msra.mxu2 %v720_v60  ;;  %v733_v31 = vld [vmem:[#allocation4 + $0x198] sm:$0xff]  ;;  %v839_v60 = vld [vmem:[%s1431_s6 + $0x40] sm:$0xff] }
  0xce   :  { %782 = vmatpush.msra.mxu1 %v701_v34  ;;  %817 = vmatpush.msra.mxu3 %v738_v21  ;;  %v732_v34 = vld [vmem:[#allocation4 + $0x190] sm:$0xff]  ;;  %v949_v21 = vld [vmem:[%s1438_s13 + $0x28] sm:$0xff] }
  0xcf   :  { %763 = vmatpush.msra.mxu0 %v684_v33  ;;  %v415_v58 = vpop.f32.mrf.mxu2  ;;  %800 = vmatpush.msra.mxu2 %v719_v4  ;;  %v831_v4 = vld [vmem:[%s1431_s6] sm:$0xff] }
  0xd0   :  { %783 = vmatpush.msra.mxu1 %v700_v36  ;;  %818 = vmatpush.msra.mxu3 %v737_v59  ;;  %v731_v36 = vld [vmem:[#allocation4 + $0x188] sm:$0xff]  ;;  %v942_v59 = vld [vmem:[%s1437_s12 + $0x30] sm:$0xff] }
  0xd1   :  { %764 = vmatpush.msra.mxu0 %v683_v35  ;;  %801 = vmatpush.msra.mxu2 %v718_v8  ;;  %v874_v8 = vld [vmem:[%s1433_s8 + $0x10] sm:$0xff] }
  0xd2   :  { %784 = vmatpush.msra.mxu1 %v699_v38  ;;  %819 = vmatpush.msra.mxu3 %v736_v23  ;;  %v730_v38 = vld [vmem:[#allocation4 + $0x180] sm:$0xff] }
  0xd3   :  { %765 = vmatpush.msra.mxu0 %v682_v37  ;;  %802 = vmatpush.msra.mxu2 %v717_v10  ;;  %v948_v23 = vld [vmem:[%s1438_s13 + $0x20] sm:$0xff] }
  0xd4   :  { %785 = vmatpush.msra.mxu1 %v698_v40  ;;  %820 = vmatpush.msra.mxu3 %v735_v26  ;;  %v940_v26 = vld [vmem:[%s1437_s12 + $0x20] sm:$0xff] }
  0xd5   :  { %803 = vmatpush.msra.mxu2 %v716_v13 }
  0xd6   :  { %821 = vmatpush.msra.mxu3 %v734_v27  ;;  %v947_v27 = vld [vmem:[%s1438_s13 + $0x18] sm:$0xff] }
  0xd7   :  { %804 = vmatpush.msra.mxu2 %v715_v15 }
  0xd8   :  { %822 = vmatpush.msra.mxu3 %v733_v31  ;;  %v945_v31 = vld [vmem:[%s1438_s13 + $0x8] sm:$0xff] }
  0xd9   :  { %805 = vmatpush.msra.mxu2 %v714_v16 }
  0xda   :  { %823 = vmatpush.msra.mxu3 %v732_v34  ;;  %v1059_v34 = vld [vmem:[%s1432_s7] ss:$0 sm:$0xff] }
  0xdc   :  { %824 = vmatpush.msra.mxu3 %v731_v36 }
  0xde   :  { %825 = vmatpush.msra.mxu3 %v730_v38  ;;  %v938_v38 = vld [vmem:[%s1437_s12 + $0x10] sm:$0xff] }
  0xe0   :  { %964 = vmatpush.msrb.mxu3 %v951_v53 }
  0xe2   :  { %965 = vmatpush.msrb.mxu3 %v950_v54 }
  0xe4   :  { %966 = vmatpush.msrb.mxu3 %v949_v21 }
  0xe5   :  { %v375_v50 = vpop.f32.mrf.mxu0 }
  0xe6   :  { %v376_v51 = vadd.f32 %v375_v50, %v350_v46  ;;  %967 = vmatpush.msrb.mxu3 %v948_v23 }
  0xe8   :  { %v395_v55 = vpop.f32.mrf.mxu1  ;;  %968 = vmatpush.msrb.mxu3 %v947_v27 }
  0xe9   :  { %v396_v57 = vadd.f32 %v395_v55, %v376_v51  ;;  %v846_v51 = vld [vmem:[%s1431_s6 + $0x78] sm:$0xff]  ;;  %v843_v55 = vld [vmem:[%s1431_s6 + $0x60] sm:$0xff] }
  0xea   :  { %851 = vmatpush.msrb.mxu0 %v846_v51  ;;  %v1008_v51 = vld [vmem:[%s1440_s15 + $0x18] sm:$0xff] }
  0xeb   :  { %v416_v61 = vadd.f32 %v415_v58, %v396_v57  ;;  %v435_v62 = vpop.f32.mrf.mxu3  ;;  %v841_v57 = vld [vmem:[%s1431_s6 + $0x50] sm:$0xff]  ;;  %v840_v58 = vld [vmem:[%s1431_s6 + $0x48] sm:$0xff] }
  0xec   :  { %852 = vmatpush.msrb.mxu0 %v845_v52  ;;  %v1007_v52 = vld [vmem:[%s1440_s15 + $0x10] sm:$0xff] }
  0xed   :  { %v436_v0 = vadd.f32 %v435_v62, %v416_v61  ;;  %v838_v61 = vld [vmem:[%s1431_s6 + $0x38] sm:$0xff]  ;;  %v837_v62 = vld [vmem:[%s1431_s6 + $0x30] sm:$0xff] }
  0xee   :  { %853 = vmatpush.msrb.mxu0 %v844_v44  ;;  %v1006_v44 = vld [vmem:[%s1440_s15 + $0x8] sm:$0xff] }
  0xef   :  { %v678_v1 = vmax.f32 %v436_v0, 0.0  ;;  %v455_v2 = vpop.f32.mrf.mxu0  ;;  %v835_v0 = vld [vmem:[%s1431_s6 + $0x20] sm:$0xff] }
  0xf0   :  { %v456_v3 = vadd.f32 %v455_v2, %v351_v63  ;;  %854 = vmatpush.msrb.mxu0 %v843_v55  ;;  %v836_v63 = vld [vmem:[%s1431_s6 + $0x28] sm:$0xff]  ;;  %v833_v2 = vld [vmem:[%s1431_s6 + $0x10] sm:$0xff]  ;;  %v1005_v55 = vld [vmem:[%s1440_s15] sm:$0xff] }
  0xf1   :  { %766 = vmatmul.f32.vlgmr.msra.gmra.mxu0 %v678_v1  ;;  %v834_v1 = vld [vmem:[%s1431_s6 + $0x18] sm:$0xff] }
  0xf2   :  { %v475_v5 = vpop.f32.mrf.mxu1  ;;  %v495_v7 = vpop.f32.mrf.mxu2  ;;  %855 = vmatpush.msrb.mxu0 %v842_v56 }
  0xf3   :  { %v476_v6 = vadd.f32 %v475_v5, %v456_v3  ;;  %v832_v3 = vld [vmem:[%s1431_s6 + $0x8] sm:$0xff]  ;;  %v906_v5 = vld [vmem:[%s1435_s10] sm:$0xff] }
  0xf4   :  { %856 = vmatpush.msrb.mxu0 %v841_v57  ;;  %930 = vmatpush.msrb.mxu2 %v906_v5  ;;  %v1062_v57 = vld [vmem:[%s1439_s14] ss:$0 sm:$0xff] }
  0xf5   :  { %v496_v9 = vadd.f32 %v495_v7, %v476_v6  ;;  %v515_v11 = vpop.f32.mrf.mxu3  ;;  %v905_v6 = vld [vmem:[%s1447_s3] sm:$0xff]  ;;  %v875_v7 = vld [vmem:[%s1433_s8 + $0x18] sm:$0xff] }
  0xf6   :  { %857 = vmatpush.msrb.mxu0 %v840_v58  ;;  %896 = vmatpush.msrb.mxu1 %v875_v7 }
  0xf7   :  { %v516_v12 = vadd.f32 %v515_v11, %v496_v9  ;;  %v1058_v9 = vld [vmem:[%s1430_s5] ss:$0 sm:$0xff] }
  0xf8   :  { %858 = vmatpush.msrb.mxu0 %v839_v60  ;;  %897 = vmatpush.msrb.mxu1 %v874_v8 }
  0xf9   :  { %v679_v14 = vmax.f32 %v516_v12, 0.0 }
  0xfa   :  { %859 = vmatpush.msrb.mxu0 %v838_v61  ;;  %898 = vmatpush.msrb.mxu1 %v873_v18 }
  0xfb   :  { %786 = vmatmul.f32.vlgmr.msra.gmra.mxu1 %v679_v14 }
  0xfc   :  { %860 = vmatpush.msrb.mxu0 %v837_v62  ;;  %899 = vmatpush.msrb.mxu1 %v872_v19 }
  0xfe   :  { %861 = vmatpush.msrb.mxu0 %v836_v63  ;;  %987 = vmatpush.msra.mxu1 %v943_v20  ;;  %v1063_v63 = vld [vmem:[%s1441_s16] ss:$0 sm:$0xff] }
 0x100   :  { %862 = vmatpush.msrb.mxu0 %v835_v0  ;;  %988 = vmatpush.msra.mxu1 %v942_v59 }
 0x102   :  { %863 = vmatpush.msrb.mxu0 %v834_v1 }
 0x104   :  { %864 = vmatpush.msrb.mxu0 %v833_v2 }
 0x106   :  { %865 = vmatpush.msrb.mxu0 %v832_v3 }
 0x108   :  { %866 = vmatpush.msrb.mxu0 %v831_v4 }
 0x10f   :  { %v535_v24 = vpop.f32.mrf.mxu0 }
 0x110   :  { %v536_v25 = vadd.f32 %v535_v24, %v352_v22  ;;  %v941_v22 = vld [vmem:[%s1437_s12 + $0x28] sm:$0xff]  ;;  %v1060_v24 = vld [vmem:[%s1436_s11] ss:$0 sm:$0xff] }
 0x111   :  { %989 = vmatpush.msra.mxu1 %v941_v22 }
 0x112   :  { %v555_v28 = vpop.f32.mrf.mxu1  ;;  %v575_v29 = vpop.f32.mrf.mxu2 }
 0x113   :  { %v556_v30 = vadd.f32 %v555_v28, %v536_v25  ;;  %v939_v28 = vld [vmem:[%s1437_s12 + $0x18] sm:$0xff]  ;;  %990 = vmatpush.msra.mxu1 %v940_v26 }
 0x115   :  { %v576_v32 = vadd.f32 %v575_v29, %v556_v30  ;;  %v595_v33 = vpop.f32.mrf.mxu3  ;;  %v946_v30 = vld [vmem:[%s1438_s13 + $0x10] sm:$0xff]  ;;  %991 = vmatpush.msra.mxu1 %v939_v28 }
 0x116   :  { %969 = vmatpush.msrb.mxu3 %v946_v30 }
 0x117   :  { %v596_v35 = vadd.f32 %v595_v33, %v576_v32  ;;  %v944_v33 = vld [vmem:[%s1438_s13] sm:$0xff]  ;;  %992 = vmatpush.msra.mxu1 %v938_v38 }
 0x118   :  { %970 = vmatpush.msrb.mxu3 %v945_v31 }
 0x119   :  { %v680_v37 = vmax.f32 %v596_v35, 0.0 }
 0x11a   :  { %971 = vmatpush.msrb.mxu3 %v944_v33 }
 0x11b   :  { %806 = vmatmul.f32.vlgmr.msra.gmra.mxu2 %v680_v37 }
 0x123   :  { %1048 = vmatmul.msk.f32.vlgmr.msrb.gmra.mxu2 %vm911_vm0, %v905_v6 }
 0x130   :  { %v615_v40 = vpop.f32.mrf.mxu0 }
 0x131   :  { %v616_v41 = vadd.f32 %v615_v40, %v353_v39  ;;  %v937_v39 = vld [vmem:[%s1437_s12 + $0x8] sm:$0xff]  ;;  %v936_v40 = vld [vmem:[%s1437_s12] sm:$0xff] }
 0x132   :  { %v635_v42 = vpop.f32.mrf.mxu1  ;;  %993 = vmatpush.msra.mxu1 %v937_v39 }
 0x133   :  { %v636_v43 = vadd.f32 %v635_v42, %v616_v41  ;;  %v1012_v41 = vld [vmem:[%s1440_s15 + $0x38] sm:$0xff]  ;;  %v1011_v42 = vld [vmem:[%s1440_s15 + $0x30] sm:$0xff] }
 0x134   :  { %v655_v45 = vpop.f32.mrf.mxu2  ;;  %994 = vmatpush.msra.mxu1 %v936_v40  ;;  %1028 = vmatpush.msra.mxu2 %v1012_v41 }
 0x135   :  { %v656_v46 = vadd.f32 %v655_v45, %v636_v43  ;;  %v1010_v43 = vld [vmem:[%s1440_s15 + $0x28] sm:$0xff]  ;;  %v1009_v45 = vld [vmem:[%s1440_s15 + $0x20] sm:$0xff] }
 0x136   :  { %1029 = vmatpush.msra.mxu2 %v1011_v42 }
 0x137   :  { %v675_v47 = vpop.f32.mrf.mxu3 }
 0x138   :  { %v676_v49 = vadd.f32 %v675_v47, %v656_v46  ;;  %1030 = vmatpush.msra.mxu2 %v1010_v43  ;;  %v1061_v46 = vld [vmem:[%s1434_s9] ss:$0 sm:$0xff] }
 0x13a   :  { %v681_v50 = vmax.f32 %v676_v49, 0.0  ;;  %1031 = vmatpush.msra.mxu2 %v1009_v45 }
 0x13c   :  { %826 = vmatmul.f32.vlgmr.msra.gmra.mxu3 %v681_v50  ;;  %1032 = vmatpush.msra.mxu2 %v1008_v51 }
 0x13e   :  { %1033 = vmatpush.msra.mxu2 %v1007_v52 }
 0x140   :  { %1034 = vmatpush.msra.mxu2 %v1006_v44 }
 0x142   :  { %1035 = vmatpush.msra.mxu2 %v1005_v55 }
 0x16e   :  { %v767_v10 = vpop.f32.mrf.mxu0 }
 0x16f   :  { %v768_v11 = vadd.f32 %v1058_v9, %v767_v10 }
 0x178   :  { %v787_v12 = vpop.f32.mrf.mxu1 }
 0x179   :  { %v788_v14 = vadd.f32 %v787_v12, %v768_v11 }
 0x19e   :  { %v807_v13 = vpop.f32.mrf.mxu2 }
 0x19f   :  { %v808_v15 = vadd.f32 %v807_v13, %v788_v14 }
 0x1a6   :  { %v932_v25 = vpop.f32.mrf.mxu2 }
 0x1a7   :  { %v933_v29 = vadd.f32 %v1060_v24, %v932_v25 }
 0x1a9   :  { %v935_v32 = vmax.f32 %v933_v29, 0.0 }
 0x1ab   :  { %1049 = vmatmul.msk.f32.vlgmr.msrb.gmra.mxu3 %vm952_vm1, %v935_v32 }
 0x1bf   :  { %v827_v16 = vpop.f32.mrf.mxu3 }
 0x1c0   :  { %v828_v48 = vadd.f32 %v827_v16, %v808_v15 }
 0x1c2   :  { %v830_v17 = vmax.f32 %v828_v48, 0.0 }
 0x1c4   :  { %867 = vmatmul.f32.vlgmr.msrb.gmra.mxu0 %v830_v17 }
 0x22e   :  { %v973_v56 = vpop.f32.mrf.mxu3 }
 0x241   :  { %v868_v35 = vpop.f32.mrf.mxu0 }
 0x242   :  { %v869_v36 = vadd.f32 %v1059_v34, %v868_v35 }
 0x244   :  { %v871_v37 = vmax.f32 %v869_v36, 0.0 }
 0x246   :  { %1047 = vmatmul.msk.f32.vlgmr.msrb.gmra.mxu1 %vm880_vm2, %v871_v37 }
 0x2c3   :  { %v901_v47 = vpop.f32.mrf.mxu1 }
 0x2c4   :  { %v902_v49 = vadd.f32 %v1061_v46, %v901_v47 }
 0x2c6   :  { %v904_v50 = vmax.f32 %v902_v49, 0.0 }
 0x2c8   :  { %1050 = vmatmul.msk.f32.vlgmr.msra.gmra.mxu1 %vm952_vm1, %v904_v50 }
 0x345   :  { %v996_v58 = vpop.f32.mrf.mxu1 }
 0x346   :  { %v997_v60 = vadd.f32 %v996_v58, %v973_v56 }
 0x348   :  { %v1003_v61 = vadd.f32 %v1062_v57, %v997_v60 }
 0x34a   :  { %v1004_v62 = vmax.f32 %v1003_v61, 0.0 }
 0x34c   :  { %1051 = vmatmul.msk.f32.vlgmr.msra.gmra.mxu2 %vm952_vm1, %v1004_v62 }
 0x3cf   :  { %v1037_v0 = vpop.f32.mrf.mxu2 }
 0x3d0   :  { %v1038_v1 = vadd.f32 %v1063_v63, %v1037_v0 }
 0x3d2   :  { %1040 = vst [vmem:[%s1442_s17] sm:$0xff] %v1038_v1 }
 0x3d3   :  { %1045 = vsyncpa [#allocation3], 1 }
 0x3d4   :  { %1046 = vsyncpa [#allocation5], 1 }

</bundles_post_ra>
